<compile_context>
chip_gen: v6e
topology: v6e:2x2x1
jax: 0.10.0
libtpu: 0.0.40
codegen_flags: <defaults>
</compile_context>

<pallas_src>
import jax
import jax.numpy as jnp
from jax import lax
from jax.experimental import pallas as pl
from jax.experimental.pallas import tpu as pltpu


def _ceil_div(a, b):
    return -(-a // b)


# ----------------------------------------------------------------------------
# Fused kernel: LIN encoder + masked frame gram + lagged-window gram.
# Grid: (n_split [parallel], B_per [arbitrary, reduction over batch]).
# Outputs are resident accumulators per split slab.
# ----------------------------------------------------------------------------
def _make_fused_stats_kernel(B, L, idim, fdim, twoT, B_per):
    def kernel(ilens_ref, xs_ref, wt_ref, bias_ref,
               gramf_ref, sumf_ref, gramw_ref, sumw_ref):
        j = pl.program_id(1)

        @pl.when(j == 0)
        def _init():
            gramf_ref[...] = jnp.zeros_like(gramf_ref)
            sumf_ref[...] = jnp.zeros_like(sumf_ref)
            gramw_ref[...] = jnp.zeros_like(gramw_ref)
            sumw_ref[...] = jnp.zeros_like(sumw_ref)

        # batch index for this grid step; ragged-split entries (bb >= B) are
        # clamped in the index_map and zero-weighted here via ilen = 0.
        bb = pl.program_id(0) * B_per + j
        ilen = jnp.where(bb < B, ilens_ref[jnp.minimum(bb, B - 1)], 0)

        # ---- fused LIN encoder: hs lives only in VMEM / vregs --------------
        hs = jnp.dot(xs_ref[...], wt_ref[...],
                     preferred_element_type=jnp.float32) + bias_ref[...]

        row_idx = lax.broadcasted_iota(jnp.int32, (L, 1), 0)

        # ---- masked frame second moment (ortho_reg_Y) ----------------------
        wf = (row_idx < ilen).astype(jnp.float32)
        hw = hs * wf
        gramf_ref[...] += lax.dot_general(
            hw, hs, (((0,), (0,)), ((), ())),
            preferred_element_type=jnp.float32)
        sumf_ref[...] += jnp.sum(hw, axis=0, keepdims=True)

        # ---- lagged-window second moment (calc_cov_from_data) --------------
        # Build the lag matrix in VMEM only.  Zero-extend hs by (2T-1) rows so
        # every lag slice has L rows (keeps contraction dim aligned); the extra
        # rows are zero-weighted so they contribute nothing.
        zero_tail = jnp.zeros((twoT - 1, fdim), jnp.float32)
        hs_ext = jnp.concatenate([hs, zero_tail], axis=0)       # (L+2T-1, fdim)
        xlag = jnp.concatenate(
            [hs_ext[i:i + L, :] for i in range(twoT)], axis=-1)  # (L, 2T*fdim)
        ww = (row_idx < (ilen - twoT + 1)).astype(jnp.float32)
        xlw = xlag * ww
        gramw_ref[...] += lax.dot_general(
            xlw, xlag, (((0,), (0,)), ((), ())),
            preferred_element_type=jnp.float32)
        sumw_ref[...] += jnp.sum(xlw, axis=0, keepdims=True)

    return kernel


def fused_dapc_stats(xs_pad, ilens, wt, bias, twoT, n_split=2):
    """One pass over xs_pad: encoder + frame gram + lag-window gram.

    xs_pad: (B, L, idim) f32;  ilens: (B,) int32
    wt:     (idim, fdim) f32  (encoder weight, transposed);  bias: (fdim,) f32
    Returns raw weighted second moments / sums:
      gram_f (fdim, fdim), sum_f (fdim,), gram_w (D, D), sum_w (D,), D = 2T*fdim
    """
    B, L, idim = xs_pad.shape
    fdim = wt.shape[1]
    D = twoT * fdim
    n_st = L - twoT + 1
    assert n_st >= 1, "sequence length must be >= 2*T"

    n_split = max(1, min(n_split, B))
    B_per = _ceil_div(B, n_split)

    kernel = _make_fused_stats_kernel(B, L, idim, fdim, twoT, B_per)

    # per-step VMEM estimate: double-buffered xs tile + resident weights &
    # accumulator slabs + in-kernel hs / lag-matrix intermediates.
    est = 4 * (2 * L * idim + 2 * (idim * fdim + fdim)
               + 2 * (fdim * fdim + fdim + D * D + D)
               + (L + twoT) * fdim + 2 * L * D)
    vmem_limit = int(min(max(2 * est, 32 * 1024 * 1024), 64 * 1024 * 1024))

    def imap_x(s, j, il):
        return (jnp.minimum(s * B_per + j, B - 1), 0, 0)

    gf, sf, gw, sw = pl.pallas_call(
        kernel,
        out_shape=(
            jax.ShapeDtypeStruct((n_split, fdim, fdim), jnp.float32),
            jax.ShapeDtypeStruct((n_split, 1, fdim), jnp.float32),
            jax.ShapeDtypeStruct((n_split, D, D), jnp.float32),
            jax.ShapeDtypeStruct((n_split, 1, D), jnp.float32),
        ),
        grid_spec=pltpu.PrefetchScalarGridSpec(
            num_scalar_prefetch=1,
            grid=(n_split, B_per),
            in_specs=[
                pl.BlockSpec((None, L, idim), imap_x),
                pl.BlockSpec((idim, fdim), lambda s, j, il: (0, 0)),
                pl.BlockSpec((1, fdim), lambda s, j, il: (0, 0)),
            ],
            out_specs=(
                pl.BlockSpec((None, fdim, fdim), lambda s, j, il: (s, 0, 0)),
                pl.BlockSpec((None, 1, fdim), lambda s, j, il: (s, 0, 0)),
                pl.BlockSpec((None, D, D), lambda s, j, il: (s, 0, 0)),
                pl.BlockSpec((None, 1, D), lambda s, j, il: (s, 0, 0)),
            ),
        ),
        compiler_params=pltpu.CompilerParams(
            dimension_semantics=("parallel", "arbitrary"),
            vmem_limit_bytes=vmem_limit,
        ),
    )(ilens.astype(jnp.int32), xs_pad, wt, bias.reshape(1, fdim))

    return gf.sum(0), sf.sum(0)[0], gw.sum(0), sw.sum(0)[0]


# ----------------------------------------------------------------------------
# DAPC forward (obj != 'vae', obj != 'cpc', encoder_type == 'lin',
#               recon_lambda == 0 so decoder is None, masked_recon=False)
# ----------------------------------------------------------------------------
def make_dapc_forward(idim, fdim, T, ortho_lambda, recon_lambda, cov_diag_reg):
    twoT = 2 * T

    @jax.jit
    def forward(enc_w, enc_b, xs_pad, ilens):
        # enc_w: (fdim, idim) torch-style weight, enc_b: (fdim,)
        B, L, _ = xs_pad.shape
        D = twoT * fdim
        n_st = L - twoT + 1

        # --- fused encoder + accumulation: single pass over xs_pad ----------
        gram_f, sum_f, gram_w, sum_w = fused_dapc_stats(
            xs_pad, ilens, enc_w.T, enc_b, twoT)

        # --- reconstruction branch: decoder is None (recon_lambda == 0) -----
        recon_loss = jnp.float32(0.0)

        # --- ortho_reg_Y(hs_pad, hmask): masked frame covariance ------------
        cnt_f = jnp.maximum(jnp.sum(ilens).astype(jnp.float32), 1.0)
        mu_f = sum_f / cnt_f
        cov_frame = (gram_f - cnt_f * jnp.outer(mu_f, mu_f)) / cnt_f
        mu_cov_frame = cov_frame  # non-VAE: self.mu_cov_frame = self.cov_frame

        # --- encoder 'lin', non-VAE: ortho_loss = ||V^T V - I||_F^2, V=W.t() -
        # tiny matmul: plain XLA is cheaper than a dedicated pallas launch.
        gram_v = jnp.dot(enc_w, enc_w.T, preferred_element_type=jnp.float32)
        ortho_loss = jnp.sum((gram_v - jnp.eye(fdim, dtype=jnp.float32)) ** 2)

        # --- calc_cov_from_data(hs_pad, hmask, 2T, toeplitzify=False, reg) ---
        per_b = jnp.clip(ilens - twoT + 1, 0, n_st).astype(jnp.float32)
        cnt_w = jnp.maximum(jnp.sum(per_b), 1.0)
        mu_w = sum_w / cnt_w
        cov = (gram_w - cnt_w * jnp.outer(mu_w, mu_w)) / cnt_w
        cov = 0.5 * (cov + cov.T) + cov_diag_reg * jnp.eye(D, dtype=jnp.float32)

        # --- calc_pi_from_cov(cov) ------------------------------------------
        # TODO(synk): logdet has no clean Pallas equivalent; kept as jnp.linalg.slogdet.
        half = T * fdim
        logdet_T = jnp.linalg.slogdet(cov[:half, :half])[1]
        logdet_2T = jnp.linalg.slogdet(cov)[1]
        pi = logdet_T - 0.5 * logdet_2T

        rate_loss = jnp.float32(0.0)
        key_loss = -pi + ortho_lambda * ortho_loss
        loss = key_loss + recon_lambda * recon_loss

        return loss, pi, ortho_loss, recon_loss, rate_loss, cov_frame, mu_cov_frame

    return forward


if __name__ == "__main__":
    # small, deterministic configuration
    B, L, idim, fdim, T = 2, 40, 16, 4, 4
    ortho_lambda = 10.0
    recon_lambda = 0.0
    cov_diag_reg = 1e-6

    key = jax.random.PRNGKey(0)
    k_w, k_x = jax.random.split(key)
    enc_w = (jax.random.normal(k_w, (fdim, idim), jnp.float32)
             / jnp.sqrt(jnp.float32(idim)))          # torch nn.Linear weight shape
    enc_b = jnp.zeros((fdim,), jnp.float32)
    xs_pad = jax.random.normal(k_x, (B, L, idim), jnp.float32)
    ilens = jnp.array([L, L - 6], dtype=jnp.int32)

    fwd = make_dapc_forward(idim, fdim, T, ortho_lambda, recon_lambda, cov_diag_reg)
    out = fwd(enc_w, enc_b, xs_pad, ilens)
    out = jax.block_until_ready(out)

    loss, pi, ortho_loss, recon_loss, rate_loss, cov_frame, mu_cov_frame = out
    print("loss       =", float(loss))
    print("pi         =", float(pi))
    print("ortho_loss =", float(ortho_loss))
    print("recon_loss =", float(recon_loss))
    print("rate_loss  =", float(rate_loss))
    print("cov_frame shape    =", cov_frame.shape)
    print("mu_cov_frame shape =", mu_cov_frame.shape)

    # ---- lightweight pure-JAX consistency check (informational only) -------
    twoT = 2 * T
    n_st = L - twoT + 1
    hs_ref = xs_pad @ enc_w.T + enc_b
    hmask = (jnp.arange(L)[None, :] < ilens[:, None]).astype(jnp.float32)
    wfr = hmask.reshape(-1)
    hflat = hs_ref.reshape(-1, fdim)
    cfr = jnp.sum(wfr)
    mfr = (wfr[:, None] * hflat).sum(0) / cfr
    cov_frame_ref = ((wfr[:, None] * hflat).T @ hflat - cfr * jnp.outer(mfr, mfr)) / cfr
    xl = jnp.concatenate([hs_ref[:, i:i + n_st, :] for i in range(twoT)], -1)
    valid = (jnp.arange(n_st)[None, :] < (ilens[:, None] - twoT + 1)).astype(jnp.float32)
    w = valid.reshape(-1)
    xf = xl.reshape(-1, twoT * fdim)
    cnt = jnp.sum(w)
    mu = (w[:, None] * xf).sum(0) / cnt
    cov_ref = ((w[:, None] * xf).T @ xf - cnt * jnp.outer(mu, mu)) / cnt
    cov_ref = 0.5 * (cov_ref + cov_ref.T) + cov_diag_reg * jnp.eye(twoT * fdim)
    pi_ref = (jnp.linalg.slogdet(cov_ref[:T * fdim, :T * fdim])[1]
              - 0.5 * jnp.linalg.slogdet(cov_ref)[1])
    print("max|cov_frame - ref| =", float(jnp.max(jnp.abs(cov_frame - cov_frame_ref))))
    print("|pi - pi_ref|        =", float(jnp.abs(pi - pi_ref)))

    print("KERNEL_OK")
</pallas_src>

<mosaic_0001>
module attributes {stable_mosaic.version = 11 : i64} {
  func.func @kernel(%arg0: i32, %arg1: i32, %arg2: memref<2xi32, #tpu.memory_space<smem>>, %arg3: memref<1x40x16xf32, #tpu.memory_space<vmem>>, %arg4: memref<16x4xf32, #tpu.memory_space<vmem>>, %arg5: memref<1x4xf32, #tpu.memory_space<vmem>>, %arg6: memref<1x4x4xf32, #tpu.memory_space<vmem>>, %arg7: memref<1x1x4xf32, #tpu.memory_space<vmem>>, %arg8: memref<1x32x32xf32, #tpu.memory_space<vmem>>, %arg9: memref<1x1x32xf32, #tpu.memory_space<vmem>>) attributes {dimension_semantics = [#tpu.dimension_semantics<parallel>, #tpu.dimension_semantics<arbitrary>], iteration_bounds = array<i64: 2, 1>, scalar_prefetch = 1 : i64, scratch_operands = 0 : i64, tpu.core_type = #tpu.core_type<tc>, window_params = [{transform_indices = @transform_0, window_bounds = array<i64: 1, 40, 16>}, {pipeline_mode = #tpu.pipeline_mode<synchronous>, transform_indices = @transform_1, window_bounds = array<i64: 16, 4>}, {pipeline_mode = #tpu.pipeline_mode<synchronous>, transform_indices = @transform_2, window_bounds = array<i64: 1, 4>}, {transform_indices = @transform_3, window_bounds = array<i64: 1, 4, 4>}, {transform_indices = @transform_4, window_bounds = array<i64: 1, 1, 4>}, {transform_indices = @transform_5, window_bounds = array<i64: 1, 32, 32>}, {transform_indices = @transform_6, window_bounds = array<i64: 1, 1, 32>}]} {
    %c0_i32 = arith.constant 0 : i32
    %0 = arith.cmpi eq, %arg1, %c0_i32 : i32
    %1 = arith.extui %0 : i1 to i32
    %c0_i32_0 = arith.constant 0 : i32
    %2 = arith.cmpi ne, %1, %c0_i32_0 : i32
    scf.if %2 {
      %cst_39 = arith.constant 0.000000e+00 : f32
      %73 = vector.broadcast %cst_39 : f32 to vector<4x4xf32>
      %c0_40 = arith.constant 0 : index
      %c0_41 = arith.constant 0 : index
      %c0_42 = arith.constant 0 : index
      %74 = vector.load %arg6[%c0_40, %c0_41, %c0_42] : memref<1x4x4xf32, #tpu.memory_space<vmem>>, vector<1x4x4xf32>
      %75 = vector.shape_cast %74 : vector<1x4x4xf32> to vector<4x4xf32>
      %76 = vector.shape_cast %73 : vector<4x4xf32> to vector<1x4x4xf32>
      tpu.vector_store %arg6[%c0_40, %c0_41, %c0_42], %76 {strides = array<i32>} : memref<1x4x4xf32, #tpu.memory_space<vmem>>, vector<1x4x4xf32>,
      %cst_43 = arith.constant 0.000000e+00 : f32
      %77 = vector.broadcast %cst_43 : f32 to vector<1x4xf32>
      %c0_44 = arith.constant 0 : index
      %c0_45 = arith.constant 0 : index
      %c0_46 = arith.constant 0 : index
      %78 = vector.load %arg7[%c0_44, %c0_45, %c0_46] : memref<1x1x4xf32, #tpu.memory_space<vmem>>, vector<1x1x4xf32>
      %79 = vector.shape_cast %78 : vector<1x1x4xf32> to vector<1x4xf32>
      %80 = vector.shape_cast %77 : vector<1x4xf32> to vector<1x1x4xf32>
      tpu.vector_store %arg7[%c0_44, %c0_45, %c0_46], %80 {strides = array<i32>} : memref<1x1x4xf32, #tpu.memory_space<vmem>>, vector<1x1x4xf32>,
      %cst_47 = arith.constant 0.000000e+00 : f32
      %81 = vector.broadcast %cst_47 : f32 to vector<32x32xf32>
      %c0_48 = arith.constant 0 : index
      %c0_49 = arith.constant 0 : index
      %c0_50 = arith.constant 0 : index
      %82 = vector.load %arg8[%c0_48, %c0_49, %c0_50] : memref<1x32x32xf32, #tpu.memory_space<vmem>>, vector<1x32x32xf32>
      %83 = vector.shape_cast %82 : vector<1x32x32xf32> to vector<32x32xf32>
      %84 = vector.shape_cast %81 : vector<32x32xf32> to vector<1x32x32xf32>
      tpu.vector_store %arg8[%c0_48, %c0_49, %c0_50], %84 {strides = array<i32>} : memref<1x32x32xf32, #tpu.memory_space<vmem>>, vector<1x32x32xf32>,
      %cst_51 = arith.constant 0.000000e+00 : f32
      %85 = vector.broadcast %cst_51 : f32 to vector<1x32xf32>
      %c0_52 = arith.constant 0 : index
      %c0_53 = arith.constant 0 : index
      %c0_54 = arith.constant 0 : index
      %86 = vector.load %arg9[%c0_52, %c0_53, %c0_54] : memref<1x1x32xf32, #tpu.memory_space<vmem>>, vector<1x1x32xf32>
      %87 = vector.shape_cast %86 : vector<1x1x32xf32> to vector<1x32xf32>
      %88 = vector.shape_cast %85 : vector<1x32xf32> to vector<1x1x32xf32>
      tpu.vector_store %arg9[%c0_52, %c0_53, %c0_54], %88 {strides = array<i32>} : memref<1x1x32xf32, #tpu.memory_space<vmem>>, vector<1x1x32xf32>,
    } else {
    }
    %c1_i32 = arith.constant 1 : i32
    %3 = arith.muli %arg0, %c1_i32 : i32
    %4 = arith.addi %3, %arg1 : i32
    %c2_i32 = arith.constant 2 : i32
    %5 = arith.cmpi slt, %4, %c2_i32 : i32
    %c1_i32_1 = arith.constant 1 : i32
    %6 = arith.minsi %4, %c1_i32_1 : i32
    %7 = arith.index_cast %6 : i32 to index
    %8 = memref.load %arg2[%7] : memref<2xi32, #tpu.memory_space<smem>>
    %c0_i32_2 = arith.constant 0 : i32
    %9 = arith.select %5, %8, %c0_i32_2 : i32
    %c0 = arith.constant 0 : index
    %c0_3 = arith.constant 0 : index
    %c0_4 = arith.constant 0 : index
    %10 = vector.load %arg3[%c0, %c0_3, %c0_4] : memref<1x40x16xf32, #tpu.memory_space<vmem>>, vector<1x40x16xf32>
    %11 = vector.shape_cast %10 : vector<1x40x16xf32> to vector<40x16xf32>
    %c0_5 = arith.constant 0 : index
    %c0_6 = arith.constant 0 : index
    %12 = vector.load %arg4[%c0_5, %c0_6] : memref<16x4xf32, #tpu.memory_space<vmem>>, vector<16x4xf32>
    %cst = arith.constant dense<0.000000e+00> : vector<40x4xf32>
    %13 = tpu.matmul %11, %12, %cst {dimension_numbers = #tpu.dot_dimension_numbers<[1], [0], [0], [1], [0, 0, 1, 1], [], []>} : vector<40x16xf32>, vector<16x4xf32>, vector<40x4xf32> -> vector<40x4xf32>
    %c0_7 = arith.constant 0 : index
    %c0_8 = arith.constant 0 : index
    %14 = vector.load %arg5[%c0_7, %c0_8] : memref<1x4xf32, #tpu.memory_space<vmem>>, vector<1x4xf32>
    %15 = vector.broadcast %14 : vector<1x4xf32> to vector<40x4xf32>
    %16 = arith.addf %13, %15 : vector<40x4xf32>
    %17 = tpu.iota {dimensions = array<i32: 0>} : vector<40x1xi32>
    %18 = vector.broadcast %9 : i32 to vector<40x1xi32>
    %19 = arith.cmpi slt, %17, %18 : vector<40x1xi32>
    %20 = arith.extui %19 : vector<40x1xi1> to vector<40x1xi32>
    %21 = arith.sitofp %20 : vector<40x1xi32> to vector<40x1xf32>
    %22 = vector.broadcast %21 : vector<40x1xf32> to vector<40x4xf32>
    %23 = arith.mulf %16, %22 : vector<40x4xf32>
    %c0_9 = arith.constant 0 : index
    %c0_10 = arith.constant 0 : index
    %c0_11 = arith.constant 0 : index
    %24 = vector.load %arg6[%c0_9, %c0_10, %c0_11] : memref<1x4x4xf32, #tpu.memory_space<vmem>>, vector<1x4x4xf32>
    %25 = vector.shape_cast %24 : vector<1x4x4xf32> to vector<4x4xf32>
    %cst_12 = arith.constant dense<0.000000e+00> : vector<4x4xf32>
    %26 = tpu.matmul %23, %16, %cst_12 {dimension_numbers = #tpu.dot_dimension_numbers<[0], [0], [1], [1], [0, 1, 1, 1], [], []>} : vector<40x4xf32>, vector<40x4xf32>, vector<4x4xf32> -> vector<4x4xf32>
    %27 = arith.addf %25, %26 : vector<4x4xf32>
    %c0_13 = arith.constant 0 : index
    %c0_14 = arith.constant 0 : index
    %c0_15 = arith.constant 0 : index
    %28 = vector.load %arg6[%c0_13, %c0_14, %c0_15] : memref<1x4x4xf32, #tpu.memory_space<vmem>>, vector<1x4x4xf32>
    %29 = vector.shape_cast %28 : vector<1x4x4xf32> to vector<4x4xf32>
    %30 = vector.shape_cast %27 : vector<4x4xf32> to vector<1x4x4xf32>
    tpu.vector_store %arg6[%c0_13, %c0_14, %c0_15], %30 {strides = array<i32>} : memref<1x4x4xf32, #tpu.memory_space<vmem>>, vector<1x4x4xf32>,
    %c0_16 = arith.constant 0 : index
    %c0_17 = arith.constant 0 : index
    %c0_18 = arith.constant 0 : index
    %31 = vector.load %arg7[%c0_16, %c0_17, %c0_18] : memref<1x1x4xf32, #tpu.memory_space<vmem>>, vector<1x1x4xf32>
    %32 = vector.shape_cast %31 : vector<1x1x4xf32> to vector<1x4xf32>
    %cst_19 = arith.constant dense<0.000000e+00> : vector<4xf32>
    %33 = vector.multi_reduction <add>, %23, %cst_19 [0] : vector<40x4xf32> to vector<4xf32>
    %34 = vector.shape_cast %33 : vector<4xf32> to vector<1x4xf32>
    %35 = arith.addf %32, %34 : vector<1x4xf32>
    %c0_20 = arith.constant 0 : index
    %c0_21 = arith.constant 0 : index
    %c0_22 = arith.constant 0 : index
    %36 = vector.load %arg7[%c0_20, %c0_21, %c0_22] : memref<1x1x4xf32, #tpu.memory_space<vmem>>, vector<1x1x4xf32>
    %37 = vector.shape_cast %36 : vector<1x1x4xf32> to vector<1x4xf32>
    %38 = vector.shape_cast %35 : vector<1x4xf32> to vector<1x1x4xf32>
    tpu.vector_store %arg7[%c0_20, %c0_21, %c0_22], %38 {strides = array<i32>} : memref<1x1x4xf32, #tpu.memory_space<vmem>>, vector<1x1x4xf32>,
    %cst_23 = arith.constant 0.000000e+00 : f32
    %39 = vector.broadcast %cst_23 : f32 to vector<7x4xf32>
    %40 = tpu.concatenate %16, %39 in 0 : vector<40x4xf32>, vector<7x4xf32> -> vector<47x4xf32>
    %41 = vector.extract_strided_slice %40 {offsets = [0, 0], sizes = [40, 4], strides = [1, 1]} : vector<47x4xf32> to vector<40x4xf32>
    %42 = vector.extract_strided_slice %40 {offsets = [1, 0], sizes = [40, 4], strides = [1, 1]} : vector<47x4xf32> to vector<40x4xf32>
    %43 = vector.extract_strided_slice %40 {offsets = [2, 0], sizes = [40, 4], strides = [1, 1]} : vector<47x4xf32> to vector<40x4xf32>
    %44 = vector.extract_strided_slice %40 {offsets = [3, 0], sizes = [40, 4], strides = [1, 1]} : vector<47x4xf32> to vector<40x4xf32>
    %45 = vector.extract_strided_slice %40 {offsets = [4, 0], sizes = [40, 4], strides = [1, 1]} : vector<47x4xf32> to vector<40x4xf32>
    %46 = vector.extract_strided_slice %40 {offsets = [5, 0], sizes = [40, 4], strides = [1, 1]} : vector<47x4xf32> to vector<40x4xf32>
    %47 = vector.extract_strided_slice %40 {offsets = [6, 0], sizes = [40, 4], strides = [1, 1]} : vector<47x4xf32> to vector<40x4xf32>
    %48 = vector.extract_strided_slice %40 {offsets = [7, 0], sizes = [40, 4], strides = [1, 1]} : vector<47x4xf32> to vector<40x4xf32>
    %49 = tpu.concatenate %41, %42, %43, %44, %45, %46, %47, %48 in 1 : vector<40x4xf32>, vector<40x4xf32>, vector<40x4xf32>, vector<40x4xf32>, vector<40x4xf32>, vector<40x4xf32>, vector<40x4xf32>, vector<40x4xf32> -> vector<40x32xf32>
    %c8_i32 = arith.constant 8 : i32
    %50 = arith.subi %9, %c8_i32 : i32
    %c1_i32_24 = arith.constant 1 : i32
    %51 = arith.addi %50, %c1_i32_24 : i32
    %52 = vector.broadcast %51 : i32 to vector<40x1xi32>
    %53 = arith.cmpi slt, %17, %52 : vector<40x1xi32>
    %54 = arith.extui %53 : vector<40x1xi1> to vector<40x1xi32>
    %55 = arith.sitofp %54 : vector<40x1xi32> to vector<40x1xf32>
    %56 = vector.broadcast %55 : vector<40x1xf32> to vector<40x32xf32>
    %57 = arith.mulf %49, %56 : vector<40x32xf32>
    %c0_25 = arith.constant 0 : index
    %c0_26 = arith.constant 0 : index
    %c0_27 = arith.constant 0 : index
    %58 = vector.load %arg8[%c0_25, %c0_26, %c0_27] : memref<1x32x32xf32, #tpu.memory_space<vmem>>, vector<1x32x32xf32>
    %59 = vector.shape_cast %58 : vector<1x32x32xf32> to vector<32x32xf32>
    %cst_28 = arith.constant dense<0.000000e+00> : vector<32x32xf32>
    %60 = tpu.matmul %57, %49, %cst_28 {dimension_numbers = #tpu.dot_dimension_numbers<[0], [0], [1], [1], [0, 1, 1, 1], [], []>} : vector<40x32xf32>, vector<40x32xf32>, vector<32x32xf32> -> vector<32x32xf32>
    %61 = arith.addf %59, %60 : vector<32x32xf32>
    %c0_29 = arith.constant 0 : index
    %c0_30 = arith.constant 0 : index
    %c0_31 = arith.constant 0 : index
    %62 = vector.load %arg8[%c0_29, %c0_30, %c0_31] : memref<1x32x32xf32, #tpu.memory_space<vmem>>, vector<1x32x32xf32>
    %63 = vector.shape_cast %62 : vector<1x32x32xf32> to vector<32x32xf32>
    %64 = vector.shape_cast %61 : vector<32x32xf32> to vector<1x32x32xf32>
    tpu.vector_store %arg8[%c0_29, %c0_30, %c0_31], %64 {strides = array<i32>} : memref<1x32x32xf32, #tpu.memory_space<vmem>>, vector<1x32x32xf32>,
    %c0_32 = arith.constant 0 : index
    %c0_33 = arith.constant 0 : index
    %c0_34 = arith.constant 0 : index
    %65 = vector.load %arg9[%c0_32, %c0_33, %c0_34] : memref<1x1x32xf32, #tpu.memory_space<vmem>>, vector<1x1x32xf32>
    %66 = vector.shape_cast %65 : vector<1x1x32xf32> to vector<1x32xf32>
    %cst_35 = arith.constant dense<0.000000e+00> : vector<32xf32>
    %67 = vector.multi_reduction <add>, %57, %cst_35 [0] : vector<40x32xf32> to vector<32xf32>
    %68 = vector.shape_cast %67 : vector<32xf32> to vector<1x32xf32>
    %69 = arith.addf %66, %68 : vector<1x32xf32>
    %c0_36 = arith.constant 0 : index
    %c0_37 = arith.constant 0 : index
    %c0_38 = arith.constant 0 : index
    %70 = vector.load %arg9[%c0_36, %c0_37, %c0_38] : memref<1x1x32xf32, #tpu.memory_space<vmem>>, vector<1x1x32xf32>
    %71 = vector.shape_cast %70 : vector<1x1x32xf32> to vector<1x32xf32>
    %72 = vector.shape_cast %69 : vector<1x32xf32> to vector<1x1x32xf32>
    tpu.vector_store %arg9[%c0_36, %c0_37, %c0_38], %72 {strides = array<i32>} : memref<1x1x32xf32, #tpu.memory_space<vmem>>, vector<1x1x32xf32>,
    return
  }
  func.func @transform_0(%arg0: i32, %arg1: i32, %arg2: memref<2xi32, #tpu.memory_space<smem>>) -> (i32, i32, i32) {
    %c1_i32 = arith.constant 1 : i32
    %0 = arith.muli %arg0, %c1_i32 : i32
    %1 = arith.addi %0, %arg1 : i32
    %c1_i32_0 = arith.constant 1 : i32
    %2 = arith.minsi %1, %c1_i32_0 : i32
    %c0_i32 = arith.constant 0 : i32
    %c0_i32_1 = arith.constant 0 : i32
    %c0_i32_2 = arith.constant 0 : i32
    return %2, %c0_i32, %c0_i32_1 : i32, i32, i32
  }
  func.func @transform_1(%arg0: i32, %arg1: i32, %arg2: memref<2xi32, #tpu.memory_space<smem>>) -> (i32, i32) {
    %c0_i32 = arith.constant 0 : i32
    %c0_i32_0 = arith.constant 0 : i32
    %c0_i32_1 = arith.constant 0 : i32
    return %c0_i32, %c0_i32_0 : i32, i32
  }
  func.func @transform_2(%arg0: i32, %arg1: i32, %arg2: memref<2xi32, #tpu.memory_space<smem>>) -> (i32, i32) {
    %c0_i32 = arith.constant 0 : i32
    %c0_i32_0 = arith.constant 0 : i32
    %c0_i32_1 = arith.constant 0 : i32
    return %c0_i32, %c0_i32_0 : i32, i32
  }
  func.func @transform_3(%arg0: i32, %arg1: i32, %arg2: memref<2xi32, #tpu.memory_space<smem>>) -> (i32, i32, i32) {
    %c0_i32 = arith.constant 0 : i32
    %c0_i32_0 = arith.constant 0 : i32
    %c0_i32_1 = arith.constant 0 : i32
    return %arg0, %c0_i32, %c0_i32_0 : i32, i32, i32
  }
  func.func @transform_4(%arg0: i32, %arg1: i32, %arg2: memref<2xi32, #tpu.memory_space<smem>>) -> (i32, i32, i32) {
    %c0_i32 = arith.constant 0 : i32
    %c0_i32_0 = arith.constant 0 : i32
    %c0_i32_1 = arith.constant 0 : i32
    return %arg0, %c0_i32, %c0_i32_0 : i32, i32, i32
  }
  func.func @transform_5(%arg0: i32, %arg1: i32, %arg2: memref<2xi32, #tpu.memory_space<smem>>) -> (i32, i32, i32) {
    %c0_i32 = arith.constant 0 : i32
    %c0_i32_0 = arith.constant 0 : i32
    %c0_i32_1 = arith.constant 0 : i32
    return %arg0, %c0_i32, %c0_i32_0 : i32, i32, i32
  }
  func.func @transform_6(%arg0: i32, %arg1: i32, %arg2: memref<2xi32, #tpu.memory_space<smem>>) -> (i32, i32, i32) {
    %c0_i32 = arith.constant 0 : i32
    %c0_i32_0 = arith.constant 0 : i32
    %c0_i32_1 = arith.constant 0 : i32
    return %arg0, %c0_i32, %c0_i32_0 : i32, i32, i32
  }
}

</mosaic_0001>

<bundles_post_ra>
// kernel: custom-call.5
= control target key start
LH: loop header
LB: loop body
LE: loop exit
PB: predicated region body
PF: predicated region fallthrough
CT: control target
= control target key end

     0   :  { %5 = vsyncpa [#allocation4], 0  ;;  %s920_s0 = inlined_call_operand.vmem [shape: f32[32,32], index: 0, kind: input, shape index: {}]   ;;  %s921_s1 = inlined_call_operand.vmem [shape: f32[32,32], index: 1, kind: output, shape index: {0}]   ;;  %s922_s2 = inlined_call_operand.hbm [shape: s32[32], index: 2, kind: output, shape index: {1}]   ;;  %s923_s3 = inlined_call_operand.hbm [shape: s32[32], index: 3, kind: output, shape index: {2}]  }
   0x1   :  { %6 = vsyncpa [#allocation7], 0  ;;  %s20_s14 = scalar_lea.vmem %s920_s0, 24 }
   0x2   :  { %p469_p0 = scmp.gt.s32.totalorder %s920_s0, %s20_s14 }
   0x3   :  { %s764_s17 = smov (!%p469_p0), [#allocation0]   ;;  %s768_s20 = smov (!%p469_p0), %s920_s0  }
   0x4   :  { %470 = sbr.rel (%p469_p0) target bundleno = 17 (0x11), region = 136 }
   0x9 LB: > { %v54_v0 = vld [vmem:[%s770_s20] sm:$0xff]  ;;  %s56_s20 = scalar_lea.vmem %s770_s20, 8   ;;  %s770_s20 = sphi %s768_s20, %s56_s20   ;;  %s766_s17 = sphi %s764_s17, %s57_s17  }
   0xa   : > { %55 = vst [vmem:[%s766_s17] sm:$0xff] %v54_v0  ;;  %s57_s17 = scalar_lea.vmem %s766_s17, 8   ;;  %p51_p1 = scmp.gt.s32.totalorder %s56_s20, %s20_s14 }
   0xc   :  { %53 = sbr.rel (!%p51_p1) target bundleno = 9 (0x9), region = 142 }
  0x11 PF:  { %v70_v1 = vld [vmem:[#allocation0] sm:$0xff]  ;;  %v74_v2 = vld [vmem:[#allocation0 + $0x8] sm:$0xff]  ;;  %v78_v3 = vld [vmem:[#allocation0 + $0x10] sm:$0xff]  ;;  %v85_v4 = vlaneseq  ;;  %v788_v6 = vmov 0   ;;  %s772_s0 = smov 0  }
  0x12   :  { %71 = vst [vmem:[#allocation1] sm:$0xff] %v70_v1  ;;  %75 = vst [vmem:[#allocation1 + $0x8] sm:$0xff] %v74_v2  ;;  %v82_v5 = vld [vmem:[#allocation0 + $0x18] sm:$0xff] }
  0x13   :  { %79 = vst [vmem:[#allocation1 + $0x10] sm:$0xff] %v78_v3  ;;  %84 = vst [vmem:[#allocation2] sm:$0x1] %v788_v6  ;;  %v821_v7 = vshrl.u32 %v85_v4, 7 }
  0x14   :  { %83 = vst [vmem:[#allocation1 + $0x18] sm:$0xff] %v82_v5 }
  0x15 LB: > { %s507_s21 = sshll.u32 %s774_s0, 3  ;;  %s93_s0 = sadd.s32 1, %s774_s0   ;;  %s774_s0 = sphi %s772_s0, %s93_s0  }
  0x16   : > { %v97_v8 = vstv %s507_s21  ;;  %s95_s22 = scalar_lea.vmem [#allocation8], %s507_s21  ;;  %p90_p2 = scmp.ge.s32.totalorder %s93_s0, 4  }
  0x17   : > { %v98_v9 = vadd.s32 %v97_v8, %v821_v7  ;;  %s824_s23 = smov (%p90_p2), 0  }
  0x18   :  { %92 = sbr.rel (!%p90_p2) target bundleno = 21 (0x15), region = 153 }
  0x19   : > { %99 = vst [vmem:[%s95_s22] sm:$0xff] %v98_v9 }
  0x1d LB: > { %v110_v10 = vld [vmem:[#allocation1] sm:$0xff]  ;;  %v122_v11 = vld [vmem:[#allocation1 + $0x8] sm:$0xff]  ;;  %v830_v12 = vadd.s32 8, %v821_v7  ;;  %v833_v14 = vstv %s778_s23  ;;  %v134_v16 = vld [vmem:[#allocation1 + $0x10] sm:$0xff]  ;;  %v838_v17 = vadd.s32 16, %v821_v7  ;;  %v845_v22 = vadd.s32 24, %v821_v7  ;;  %s778_s23 = sphi %s824_s23, %s105_s23  }
  0x1e   : > { %v111_v13 = vand.u32 2147483647, %v110_v10  ;;  %v123_v15 = vand.u32 2147483647, %v122_v11  ;;  %vm114_vm0 = vcmp.ge.s32.totalorder %v821_v7, %v833_v14  ;;  %v135_v20 = vand.u32 2147483647, %v134_v16 }
  0x1f   : > { %vm126_vm3 = vcmp.ge.s32.totalorder %v830_v12, %v833_v14  ;;  %v146_v21 = vld [vmem:[#allocation1 + $0x18] sm:$0xff]  ;;  %vm138_vm6 = vcmp.ge.s32.totalorder %v838_v17, %v833_v14  ;;  %vm150_vm9 = vcmp.ge.s32.totalorder %v845_v22, %v833_v14  ;;  %s192_s24 = ssub.s32 128, %s778_s23  ;;  %v198_v58 = vand.u32 127, %v85_v4  ;;  %v201_v60 = vld [vmem:[#allocation2] ss:$0 sm:$0xff]  ;;  %s204_s25 = scalar_lea.vmem [#allocation1], %s778_s23 }
  0x20   : > { %vm509_vm1 = vcmp.gt.f32.partialorder %v111_v13, -inf  ;;  %v147_v25 = vand.u32 2147483647, %v146_v21  ;;  %v206_v61 = vld [vmem:[%s204_s25] ss:$0 sm:$0xff]  ;;  %s210_s27 = scalar_lea.vmem [#allocation8], %s778_s23 }
  0x21   : > { %vm118_vm2 = vmand %vm114_vm0, %vm509_vm1  ;;  %v212_v62 = vld [vmem:[%s210_s27] ss:$0 sm:$0xff]  ;;  %s105_s23 = sadd.s32 1, %s778_s23  }
  0x22   : > { %v119_v18 = vsel %vm118_vm2, %v821_v7, %v833_v14  ;;  %v120_v19 = vsel %vm118_vm2, %v111_v13, -inf  ;;  %p102_p3 = scmp.ge.s32.totalorder %s105_s23, 32  }
  0x23   : > { %vm129_vm4 = vcmp.lt.f32.partialorder %v120_v19, %v123_v15  ;;  %s780_s5 = smov (%p102_p3), %s921_s1   ;;  %s784_s6 = smov (%p102_p3), [#allocation1]  }
  0x24   : > { %vm130_vm5 = vmand %vm126_vm3, %vm129_vm4  ;;  %vm857_vm3 = vcmp.eq.s32.totalorder %v198_v58, %v833_v14 }
  0x25   : > { %v131_v23 = vsel %vm130_vm5, %v830_v12, %v119_v18  ;;  %v132_v24 = vsel %vm130_vm5, %v123_v15, %v120_v19  ;;  %vm245_vm5 = vcmp.gt.s32.totalorder %v830_v12, %v833_v14 }
  0x26   : > { %vm141_vm7 = vcmp.lt.f32.partialorder %v132_v24, %v135_v20 }
  0x27   : > { %vm142_vm8 = vmand %vm138_vm6, %vm141_vm7  ;;  %vm230_vm6 = vcmp.gt.s32.totalorder %v821_v7, %v833_v14  ;;  %vm260_vm7 = vcmp.gt.s32.totalorder %v838_v17, %v833_v14 }
  0x28   : > { %v143_v26 = vsel %vm142_vm8, %v838_v17, %v131_v23  ;;  %v144_v27 = vsel %vm142_vm8, %v135_v20, %v132_v24 }
  0x29   : > { %vm153_vm10 = vcmp.lt.f32.partialorder %v144_v27, %v147_v25 }
  0x2a   : > { %vm154_vm11 = vmand %vm150_vm9, %vm153_vm10  ;;  %vm275_vm9 = vcmp.gt.s32.totalorder %v845_v22, %v833_v14 }
  0x2b   : > { %v155_v28 = vsel %vm154_vm11, %v845_v22, %v143_v26  ;;  %v156_v29 = vsel %vm154_vm11, %v147_v25, %v144_v27  ;;  %vm249_vm10 = vmand %vm245_vm5, %vm857_vm3 }
  0x2c   : > { %v157_v30 = vrot.slane %v156_v29, 1  ;;  %v158_v31 = vrot.slane %v155_v28, 1  ;;  %vm234_vm11 = vmand %vm230_vm6, %vm857_vm3 }
  0x2e   : > { %vm159_vm12 = vcmp.ge.f32.partialorder %v157_v30, %v156_v29  ;;  %v162_v32 = vrot.slane %v157_v30, 1  ;;  %v163_v33 = vrot.slane %v158_v31, 1 }
  0x2f   : > { %v160_v34 = vsel %vm159_vm12, %v157_v30, %v156_v29  ;;  %v161_v35 = vsel %vm159_vm12, %v158_v31, %v155_v28  ;;  %vm264_vm12 = vmand %vm260_vm7, %vm857_vm3 }
  0x30   : > { %vm164_vm13 = vcmp.ge.f32.partialorder %v162_v32, %v160_v34  ;;  %v167_v36 = vrot.slane %v162_v32, 1  ;;  %v168_v37 = vrot.slane %v163_v33, 1 }
  0x31   : > { %v165_v38 = vsel %vm164_vm13, %v162_v32, %v160_v34  ;;  %v166_v39 = vsel %vm164_vm13, %v163_v33, %v161_v35  ;;  %vm279_vm13 = vmand %vm275_vm9, %vm857_vm3 }
  0x32   : > { %vm169_vm14 = vcmp.ge.f32.partialorder %v167_v36, %v165_v38  ;;  %v172_v40 = vrot.slane %v167_v36, 1  ;;  %v173_v41 = vrot.slane %v168_v37, 1 }
  0x33   : > { %v170_v42 = vsel %vm169_vm14, %v167_v36, %v165_v38  ;;  %v171_v43 = vsel %vm169_vm14, %v168_v37, %v166_v39  ;;  %vm222_vm14 = vcmp.gt.s32.totalorder %v198_v58, %v833_v14 }
  0x34   : > { %vm174_vm15 = vcmp.ge.f32.partialorder %v172_v40, %v170_v42  ;;  %v177_v44 = vrot.slane %v172_v40, 1  ;;  %v178_v45 = vrot.slane %v173_v41, 1 }
  0x35   : > { %v175_v46 = vsel %vm174_vm15, %v172_v40, %v170_v42  ;;  %v176_v47 = vsel %vm174_vm15, %v173_v41, %v171_v43 }
  0x36   : > { %vm179_vm0 = vcmp.ge.f32.partialorder %v177_v44, %v175_v46  ;;  %v182_v48 = vrot.slane %v177_v44, 1  ;;  %v183_v49 = vrot.slane %v178_v45, 1 }
  0x37   : > { %v180_v50 = vsel %vm179_vm0, %v177_v44, %v175_v46  ;;  %v181_v51 = vsel %vm179_vm0, %v178_v45, %v176_v47 }
  0x38   : > { %vm184_vm1 = vcmp.ge.f32.partialorder %v182_v48, %v180_v50  ;;  %v187_v52 = vrot.slane %v182_v48, 1  ;;  %v188_v53 = vrot.slane %v183_v49, 1 }
  0x39   : > { %v185_v54 = vsel %vm184_vm1, %v182_v48, %v180_v50  ;;  %v186_v55 = vsel %vm184_vm1, %v183_v49, %v181_v51 }
  0x3a   : > { %vm189_vm2 = vcmp.ge.f32.partialorder %v187_v52, %v185_v54 }
  0x3b   : > { %v191_v56 = vsel %vm189_vm2, %v188_v53, %v186_v55 }
  0x3c   : > { %193 = vrot.lane.b32.xlu0 %v191_v56, %s192_s24 }
  0xae   : > { %v194_v57 = vpop.permute.xlu0 %193 }
  0xaf   : > { %514 = vpush %v194_v57 }
  0xe0   : > { %s515_s26 = spop %514 }
  0xe1   : > { %v200_v63 = vstv %s515_s26  ;;  %s205_s28 = scalar_lea.vmem [#allocation1], %s515_s26  ;;  %s211_s29 = scalar_lea.vmem [#allocation8], %s515_s26 }
  0xe2   : > { %v202_v0 = vsel %vm857_vm3, %v200_v63, %v201_v60  ;;  %v207_v1 = vld [vmem:[%s205_s28] ss:$0 sm:$0xff] }
  0xe3   : > { %v213_v2 = vld [vmem:[%s211_s29] ss:$0 sm:$0xff]  ;;  %203 = vst [vmem:[#allocation2] sm:$0x1] %v202_v0  ;;  %208 = vst [vmem:[%s205_s28] sm:$0x1] %v206_v61  ;;  %vm216_vm4 = vcmp.ne.f32.partialorder %v207_v1, 0.0 }
  0xe4   : > { %214 = vst [vmem:[%s211_s29] sm:$0x1] %v212_v62  ;;  %209 = vst [vmem:[%s204_s25] sm:$0x1] %v207_v1  ;;  %v223_v29 = vsel %vm222_vm14, %v207_v1, 0.0 }
  0xe5   : > { %215 = vst [vmem:[%s210_s27] sm:$0x1] %v213_v2  ;;  %vm217_vm8 = vmand %vm857_vm3, %vm216_vm4 }
  0xe6   : > { %v218_v3 = vsel %vm217_vm8, %v207_v1, 1.0 }
  0xe7   : > { %v246_v5 = vsel %vm245_vm5, %v218_v3, 1.0  ;;  %v231_v6 = vsel %vm230_vm6, %v218_v3, 1.0  ;;  %v261_v8 = vsel %vm260_vm7, %v218_v3, 1.0  ;;  %v276_v9 = vsel %vm275_vm9, %v218_v3, 1.0 }
  0xe8   : > { %648 = vrcp.f32 %v246_v5 }
  0xe9   : > { %650 = vrcp.f32 %v231_v6 }
  0xea   : > { %652 = vrcp.f32 %v261_v8  ;;  %v342_v41 = vld [vmem:[#allocation2] sm:$0x1] (%p102_p3) }
  0xeb   : > { %654 = vrcp.f32 %v276_v9  ;;  %v242_v11 = vld [vmem:[#allocation1 + $0x8] sm:$0xff]  ;;  %v227_v16 = vld [vmem:[#allocation1] sm:$0xff]  ;;  %v257_v20 = vld [vmem:[#allocation1 + $0x10] sm:$0xff]  ;;  %345 = vst [vmem:[#allocation3] sm:$0x1] (%p102_p3), %v342_v41 }
  0xec   : > { %v272_v12 = vld [vmem:[#allocation1 + $0x18] sm:$0xff]  ;;  %v290_v42 = vld [vmem:[#allocation8 + $0x10] sm:$0xff] (%p102_p3)  ;;  %v292_v43 = vld [vmem:[#allocation8 + $0x18] sm:$0xff] (%p102_p3) }
  0xed   :  { %v286_v14 = vld [vmem:[#allocation8] sm:$0xff] (%p102_p3)  ;;  %v288_v40 = vld [vmem:[#allocation8 + $0x8] sm:$0xff] (%p102_p3) }
  0xf5   : > { %v649_v10 = vpop.eup %648 }
  0xf6   : > { %v651_v13 = vpop.eup %650  ;;  %v248_v15 = vmul.f32 %v649_v10, %v242_v11 }
  0xf7   : > { %v653_v18 = vpop.eup %652  ;;  %v233_v19 = vmul.f32 %v651_v13, %v227_v16 }
  0xf8   : > { %v250_v21 = vsel %vm249_vm10, %v248_v15, 0.0  ;;  %v263_v23 = vmul.f32 %v653_v18, %v257_v20  ;;  %v655_v24 = vpop.eup %654 }
  0xf9   : > { %251 = vadd.xlane.f32.xlu1 %v250_v21  ;;  %v235_v25 = vsel %vm234_vm11, %v233_v19, 0.0  ;;  %v278_v27 = vmul.f32 %v655_v24, %v272_v12 }
  0xfa   : > { %236 = vadd.xlane.f32.xlu0 %v235_v25  ;;  %v265_v26 = vsel %vm264_vm12, %v263_v23, 0.0 }
  0xfb   : > { %v280_v28 = vsel %vm279_vm13, %v278_v27, 0.0 }
  0xfd   : > { %266 = vadd.xlane.f32.xlu1 %v265_v26 }
 0x101   : > { %281 = vadd.xlane.f32.xlu1 %v280_v28 }
 0x127   :  { %305 = vxpose.xlu0.b32.start [1/4] (short) (narrow) (%p102_p3), %v286_v14, 8 }
 0x12b   :  { %306 = vxpose.xlu0.b32.cont [2/4] (short) (narrow) (%p102_p3), %v288_v40, 8 }
 0x12f   :  { %307 = vxpose.xlu0.b32.cont [3/4] (short) (narrow) (%p102_p3), %v290_v42, 8 }
 0x133   :  { %308 = vxpose.xlu0.b32.end [4/4] (short) (narrow) (%p102_p3), %v292_v43, 8 }
 0x182   : > { %v252_v30 = vpop.xlane.xlu1 %251 }
 0x183   : > { %v253_v31 = vmul.f32 %v252_v30, %v223_v29  ;;  %v237_v17 = vpop.xlane.xlu0 %236 }
 0x184   : > { %v238_v32 = vmul.f32 %v237_v17, %v223_v29 }
 0x185   : > { %v254_v33 = vsub.f32 %v248_v15, %v253_v31 }
 0x186   : > { %v239_v34 = vsub.f32 %v233_v19, %v238_v32  ;;  %v267_v35 = vpop.xlane.xlu1 %266 }
 0x187   : > { %255 = vst [vmem:[#allocation1 + $0x8] sm:$0xff] %v254_v33  ;;  %v268_v36 = vmul.f32 %v267_v35, %v223_v29 }
 0x188   : > { %240 = vst [vmem:[#allocation1] sm:$0xff] %v239_v34 }
 0x189   : > { %v269_v37 = vsub.f32 %v263_v23, %v268_v36 }
 0x18a   : > { %v282_v38 = vpop.xlane.xlu1 %281 }
 0x18b   : > { %270 = vst [vmem:[#allocation1 + $0x10] sm:$0xff] %v269_v37  ;;  %v283_v22 = vmul.f32 %v282_v38, %v223_v29 }
 0x18d   : > { %v284_v39 = vsub.f32 %v278_v27, %v283_v22 }
 0x18f   : > { %285 = vst [vmem:[#allocation1 + $0x18] sm:$0xff] %v284_v39 }
 0x190   :  { %104 = sbr.rel (!%p102_p3) target bundleno = 29 (0x1d), region = 164 }
 0x1a3   :  { %v321_v44 = vpop.trf.xlu0 }
 0x1a4   :  { %337 = vst [vmem:[#allocation5] sm:$0x1] %v321_v44 }
 0x1ab   :  { %v350_v45 = vld [vmem:[#allocation5] sm:$0x1] }
 0x1ac   :  { %353 = vst [vmem:[#allocation6] sm:$0x1] %v350_v45 }
 0x1ad LB: > { %v401_v4 = vld [vmem:[%s786_s6] sm:$0xff]  ;;  %s403_s6 = scalar_lea.vmem %s786_s6, 8   ;;  %s786_s6 = sphi %s784_s6, %s403_s6   ;;  %s782_s5 = sphi %s780_s5, %s404_s5  }
 0x1ae   : > { %402 = vst [vmem:[%s782_s5] sm:$0xff] %v401_v4  ;;  %s404_s5 = scalar_lea.vmem %s782_s5, 8   ;;  %p398_p4 = scmp.gt.s32.totalorder %s403_s6, [#allocation1 + $0x18] }
 0x1af   :  { %s789_s7 = smov (%p398_p4), [#allocation3]   ;;  %s790_s9 = smov (%p398_p4), [#allocation6]  }
 0x1b0   :  { %400 = sbr.rel (!%p398_p4) target bundleno = 429 (0x1ad), region = 186  ;;  %s422_s8 = sshll.u32 (%p398_p4), %s789_s7, 4  ;;  %s423_s8 = int_to_ptr.vmem [resolvable:$true] %s422_s8 }
 0x1b1   :  { %s431_s10 = sshll.u32 (%p398_p4), %s790_s9, 4  ;;  %s656_s1 = scalar_lea.vmem (%p398_p4), %s423_s8, 16  ;;  %s432_s10 = int_to_ptr.vmem [resolvable:$true] %s431_s10 }
 0x1b2   :  { %p657_p5 = scmp.ne.s32.totalorder (%p398_p4), %s423_s8, %s656_s1  ;;  %s660_s11 = scalar_lea.vmem (%p398_p4), %s423_s8, 32 }
 0x1b3   :  { %p661_p6 = scmp.lt.s32.totalorder (%p398_p4), %s423_s8, %s423_s8  ;;  %p662_p7 = scmp.lt.s32.totalorder (%p398_p4), %s660_s11, %s656_s1 }
 0x1b5   :  { %p663_p8 = por %p662_p7, %p661_p6 }
 0x1b7   :  { %p664_p9 = pnand %p663_p8, %p657_p5 }
 0x1b9   :  { %667 = shalt.err (!%p664_p9)
}
 0x1ba   :  { %425 = dma.vmem_to_hbm [thread:$0]  %s423_s8, 16, %s922_s2, [#allocation4]  }
 0x1bb   :  { %s676_s14 = scalar_lea.vmem %s432_s10, 16  ;;  %s680_s15 = scalar_lea.vmem %s432_s10, 32 }
 0x1bc   :  { %p677_p10 = scmp.ne.s32.totalorder %s432_s10, %s676_s14  ;;  %p681_p11 = scmp.lt.s32.totalorder %s432_s10, %s432_s10 }
 0x1bd   :  { %p682_p12 = scmp.lt.s32.totalorder %s680_s15, %s676_s14 }
 0x1bf   :  { %p683_p13 = por %p682_p12, %p681_p11 }
 0x1c1   :  { %p684_p0 = pnand %p683_p13, %p677_p10 }
 0x1c3   :  { %687 = shalt.err (!%p684_p0)
}
 0x1c4   :  { %434 = dma.vmem_to_hbm [thread:$0]  %s432_s10, 16, %s923_s3, [#allocation7]  }
 0x1c5   :  { %760 = dma.done.wait [#allocation4], 16  }
 0x1c6   :  { %761 = vsyncadd [#allocation4], 4294967280 }
 0x1c7   :  { %762 = dma.done.wait [#allocation7], 16  }
 0x1c8   :  { %763 = vsyncadd [#allocation7], 4294967280 }
 0x1c9   :  { %441 = vsyncpa [#allocation4], 1 }
 0x1ca   :  { %442 = vsyncpa [#allocation7], 1 }

// kernel: custom-call.4
= control target key start
LH: loop header
LB: loop body
LE: loop exit
PB: predicated region body
PF: predicated region fallthrough
CT: control target
= control target key end

     0   :  { %5 = vsyncpa [#allocation4], 0  ;;  %s818_s0 = inlined_call_operand.vmem [shape: f32[16,16], index: 0, kind: input, shape index: {}]   ;;  %s819_s1 = inlined_call_operand.vmem [shape: f32[16,16], index: 1, kind: output, shape index: {0}]   ;;  %s820_s2 = inlined_call_operand.hbm [shape: s32[16], index: 2, kind: output, shape index: {1}]   ;;  %s821_s3 = inlined_call_operand.hbm [shape: s32[16], index: 3, kind: output, shape index: {2}]  }
   0x1   :  { %6 = vsyncpa [#allocation7], 0  ;;  %s20_s14 = scalar_lea.vmem %s818_s0, 8 }
   0x2   :  { %p405_p0 = scmp.gt.s32.totalorder %s818_s0, %s20_s14 }
   0x3   :  { %s696_s17 = smov (!%p405_p0), [#allocation0]   ;;  %s700_s20 = smov (!%p405_p0), %s818_s0  }
   0x4   :  { %406 = sbr.rel (%p405_p0) target bundleno = 17 (0x11), region = 128 }
   0x9 LB: > { %v54_v0 = vld [vmem:[%s702_s20] sm:$0xff]  ;;  %s56_s20 = scalar_lea.vmem %s702_s20, 8   ;;  %s702_s20 = sphi %s700_s20, %s56_s20   ;;  %s698_s17 = sphi %s696_s17, %s57_s17  }
   0xa   : > { %55 = vst [vmem:[%s698_s17] sm:$0xff] %v54_v0  ;;  %s57_s17 = scalar_lea.vmem %s698_s17, 8   ;;  %p51_p1 = scmp.gt.s32.totalorder %s56_s20, %s20_s14 }
   0xc   :  { %53 = sbr.rel (!%p51_p1) target bundleno = 9 (0x9), region = 134 }
  0x11 PF:  { %v70_v1 = vld [vmem:[#allocation0] sm:$0xff]  ;;  %v74_v2 = vld [vmem:[#allocation0 + $0x8] sm:$0xff]  ;;  %v77_v3 = vlaneseq  ;;  %v720_v4 = vmov 0   ;;  %s704_s0 = smov 0  }
  0x12   :  { %71 = vst [vmem:[#allocation1] sm:$0xff] %v70_v1  ;;  %75 = vst [vmem:[#allocation1 + $0x8] sm:$0xff] %v74_v2 }
  0x13   :  { %76 = vst [vmem:[#allocation2] sm:$0x1] %v720_v4  ;;  %v753_v5 = vshrl.u32 %v77_v3, 7 }
  0x14 LB: > { %s443_s21 = sshll.u32 %s706_s0, 3  ;;  %s85_s0 = sadd.s32 1, %s706_s0   ;;  %s706_s0 = sphi %s704_s0, %s85_s0  }
  0x15   : > { %v89_v6 = vstv %s443_s21  ;;  %s87_s22 = scalar_lea.vmem [#allocation8], %s443_s21  ;;  %p82_p2 = scmp.ge.s32.totalorder %s85_s0, 2  }
  0x16   : > { %v90_v7 = vadd.s32 %v89_v6, %v753_v5  ;;  %s756_s23 = smov (%p82_p2), 0  }
  0x17   :  { %84 = sbr.rel (!%p82_p2) target bundleno = 20 (0x14), region = 145 }
  0x18   : > { %91 = vst [vmem:[%s87_s22] sm:$0xff] %v90_v7 }
  0x1c LB: > { %v102_v8 = vld [vmem:[#allocation1] sm:$0xff]  ;;  %v114_v9 = vld [vmem:[#allocation1 + $0x8] sm:$0xff]  ;;  %v762_v10 = vadd.s32 8, %v753_v5  ;;  %v765_v12 = vstv %s710_s23  ;;  %s160_s24 = ssub.s32 128, %s710_s23  ;;  %v166_v45 = vand.u32 127, %v77_v3  ;;  %s172_s25 = scalar_lea.vmem [#allocation1], %s710_s23  ;;  %s710_s23 = sphi %s756_s23, %s97_s23  }
  0x1d   : > { %v103_v11 = vand.u32 2147483647, %v102_v8  ;;  %v115_v13 = vand.u32 2147483647, %v114_v9  ;;  %vm106_vm0 = vcmp.ge.s32.totalorder %v753_v5, %v765_v12  ;;  %v169_v48 = vld [vmem:[#allocation2] ss:$0 sm:$0xff] }
  0x1e   : > { %vm118_vm3 = vcmp.ge.s32.totalorder %v762_v10, %v765_v12  ;;  %vm190_vm13 = vcmp.gt.s32.totalorder %v166_v45, %v765_v12  ;;  %vm213_vm14 = vcmp.gt.s32.totalorder %v762_v10, %v765_v12  ;;  %vm167_vm15 = vcmp.eq.s32.totalorder %v166_v45, %v765_v12  ;;  %v174_v49 = vld [vmem:[%s172_s25] ss:$0 sm:$0xff]  ;;  %s178_s27 = scalar_lea.vmem [#allocation8], %s710_s23  ;;  %s97_s23 = sadd.s32 1, %s710_s23  }
  0x1f   : > { %vm445_vm1 = vcmp.gt.f32.partialorder %v103_v11, -inf  ;;  %v180_v50 = vld [vmem:[%s178_s27] ss:$0 sm:$0xff]  ;;  %p94_p3 = scmp.ge.s32.totalorder %s97_s23, 16  }
  0x20   : > { %vm110_vm2 = vmand %vm106_vm0, %vm445_vm1  ;;  %s712_s5 = smov (%p94_p3), %s819_s1   ;;  %s716_s6 = smov (%p94_p3), [#allocation1]  }
  0x21   : > { %v111_v14 = vsel %vm110_vm2, %v753_v5, %v765_v12  ;;  %v112_v15 = vsel %vm110_vm2, %v103_v11, -inf  ;;  %vm785_vm0 = vmand %vm213_vm14, %vm167_vm15  ;;  %vm198_vm2 = vcmp.gt.s32.totalorder %v753_v5, %v765_v12 }
  0x22   : > { %vm121_vm4 = vcmp.lt.f32.partialorder %v112_v15, %v115_v13 }
  0x23   : > { %vm122_vm5 = vmand %vm118_vm3, %vm121_vm4 }
  0x24   : > { %v123_v16 = vsel %vm122_vm5, %v762_v10, %v111_v14  ;;  %v124_v17 = vsel %vm122_vm5, %v115_v13, %v112_v15  ;;  %vm202_vm4 = vmand %vm198_vm2, %vm167_vm15 }
  0x25   : > { %v125_v18 = vrot.slane %v124_v17, 1  ;;  %v126_v19 = vrot.slane %v123_v16, 1 }
  0x27   : > { %vm127_vm6 = vcmp.ge.f32.partialorder %v125_v18, %v124_v17  ;;  %v130_v20 = vrot.slane %v125_v18, 1  ;;  %v131_v21 = vrot.slane %v126_v19, 1 }
  0x28   : > { %v128_v22 = vsel %vm127_vm6, %v125_v18, %v124_v17  ;;  %v129_v23 = vsel %vm127_vm6, %v126_v19, %v123_v16 }
  0x29   : > { %vm132_vm7 = vcmp.ge.f32.partialorder %v130_v20, %v128_v22  ;;  %v135_v24 = vrot.slane %v130_v20, 1  ;;  %v136_v25 = vrot.slane %v131_v21, 1 }
  0x2a   : > { %v133_v26 = vsel %vm132_vm7, %v130_v20, %v128_v22  ;;  %v134_v27 = vsel %vm132_vm7, %v131_v21, %v129_v23 }
  0x2b   : > { %vm137_vm8 = vcmp.ge.f32.partialorder %v135_v24, %v133_v26  ;;  %v140_v28 = vrot.slane %v135_v24, 1  ;;  %v141_v29 = vrot.slane %v136_v25, 1 }
  0x2c   : > { %v138_v30 = vsel %vm137_vm8, %v135_v24, %v133_v26  ;;  %v139_v31 = vsel %vm137_vm8, %v136_v25, %v134_v27 }
  0x2d   : > { %vm142_vm9 = vcmp.ge.f32.partialorder %v140_v28, %v138_v30  ;;  %v145_v32 = vrot.slane %v140_v28, 1  ;;  %v146_v33 = vrot.slane %v141_v29, 1 }
  0x2e   : > { %v143_v34 = vsel %vm142_vm9, %v140_v28, %v138_v30  ;;  %v144_v35 = vsel %vm142_vm9, %v141_v29, %v139_v31 }
  0x2f   : > { %vm147_vm10 = vcmp.ge.f32.partialorder %v145_v32, %v143_v34  ;;  %v150_v36 = vrot.slane %v145_v32, 1  ;;  %v151_v37 = vrot.slane %v146_v33, 1 }
  0x30   : > { %v148_v38 = vsel %vm147_vm10, %v145_v32, %v143_v34  ;;  %v149_v39 = vsel %vm147_vm10, %v146_v33, %v144_v35 }
  0x31   : > { %vm152_vm11 = vcmp.ge.f32.partialorder %v150_v36, %v148_v38  ;;  %v155_v40 = vrot.slane %v150_v36, 1  ;;  %v156_v41 = vrot.slane %v151_v37, 1 }
  0x32   : > { %v153_v42 = vsel %vm152_vm11, %v150_v36, %v148_v38  ;;  %v154_v43 = vsel %vm152_vm11, %v151_v37, %v149_v39 }
  0x33   : > { %vm157_vm12 = vcmp.ge.f32.partialorder %v155_v40, %v153_v42 }
  0x34   : > { %v159_v44 = vsel %vm157_vm12, %v156_v41, %v154_v43 }
  0x35   : > { %161 = vrot.lane.b32.xlu0 %v159_v44, %s160_s24 }
  0xa7   : > { %v162_v47 = vpop.permute.xlu0 %161 }
  0xa8   : > { %450 = vpush %v162_v47 }
  0xd9   : > { %s451_s26 = spop %450 }
  0xda   : > { %v168_v51 = vstv %s451_s26  ;;  %s173_s28 = scalar_lea.vmem [#allocation1], %s451_s26  ;;  %s179_s29 = scalar_lea.vmem [#allocation8], %s451_s26 }
  0xdb   : > { %v170_v52 = vsel %vm167_vm15, %v168_v51, %v169_v48  ;;  %v175_v53 = vld [vmem:[%s173_s28] ss:$0 sm:$0xff] }
  0xdc   : > { %v181_v54 = vld [vmem:[%s179_s29] ss:$0 sm:$0xff]  ;;  %171 = vst [vmem:[#allocation2] sm:$0x1] %v170_v52  ;;  %176 = vst [vmem:[%s173_s28] sm:$0x1] %v174_v49  ;;  %vm184_vm1 = vcmp.ne.f32.partialorder %v175_v53, 0.0 }
  0xdd   : > { %182 = vst [vmem:[%s179_s29] sm:$0x1] %v180_v50  ;;  %177 = vst [vmem:[%s172_s25] sm:$0x1] %v175_v53  ;;  %v191_v2 = vsel %vm190_vm13, %v175_v53, 0.0 }
  0xde   : > { %183 = vst [vmem:[%s178_s27] sm:$0x1] %v181_v54  ;;  %vm185_vm3 = vmand %vm167_vm15, %vm184_vm1 }
  0xdf   : > { %v186_v55 = vsel %vm185_vm3, %v175_v53, 1.0 }
  0xe0   : > { %v214_v56 = vsel %vm213_vm14, %v186_v55, 1.0  ;;  %v199_v57 = vsel %vm198_vm2, %v186_v55, 1.0 }
  0xe1   : > { %584 = vrcp.f32 %v214_v56 }
  0xe2   : > { %586 = vrcp.f32 %v199_v57 }
  0xe3   :  { %v278_v12 = vld [vmem:[#allocation2] sm:$0x1] (%p94_p3) }
  0xe4   : > { %v210_v59 = vld [vmem:[#allocation1 + $0x8] sm:$0xff]  ;;  %v195_v62 = vld [vmem:[#allocation1] sm:$0xff]  ;;  %281 = vst [vmem:[#allocation3] sm:$0x1] (%p94_p3), %v278_v12 }
  0xe5   :  { %v224_v11 = vld [vmem:[#allocation8] sm:$0xff] (%p94_p3)  ;;  %v226_v13 = vld [vmem:[#allocation8 + $0x8] sm:$0xff] (%p94_p3) }
  0xee   : > { %v585_v58 = vpop.eup %584 }
  0xef   : > { %v587_v60 = vpop.eup %586  ;;  %v216_v61 = vmul.f32 %v585_v58, %v210_v59 }
  0xf0   : > { %v201_v63 = vmul.f32 %v587_v60, %v195_v62 }
  0xf1   : > { %v218_v0 = vsel %vm785_vm0, %v216_v61, 0.0 }
  0xf2   : > { %219 = vadd.xlane.f32.xlu1 %v218_v0  ;;  %v203_v1 = vsel %vm202_vm4, %v201_v63, 0.0 }
  0xf3   : > { %204 = vadd.xlane.f32.xlu0 %v203_v1 }
 0x120   :  { %241 = vxpose.xlu0.b32.start [1/2] (short) (narrow) (%p94_p3), %v224_v11, 8 }
 0x124   :  { %242 = vxpose.xlu0.b32.end [2/2] (short) (narrow) (%p94_p3), %v226_v13, 8 }
 0x17b   : > { %v220_v4 = vpop.xlane.xlu1 %219 }
 0x17c   : > { %v221_v6 = vmul.f32 %v220_v4, %v191_v2  ;;  %v205_v7 = vpop.xlane.xlu0 %204 }
 0x17d   : > { %v206_v8 = vmul.f32 %v205_v7, %v191_v2  ;;  %96 = sbr.rel (!%p94_p3) target bundleno = 28 (0x1c), region = 156 }
 0x17e   : > { %v222_v9 = vsub.f32 %v216_v61, %v221_v6 }
 0x17f   : > { %v207_v10 = vsub.f32 %v201_v63, %v206_v8 }
 0x180   : > { %223 = vst [vmem:[#allocation1 + $0x8] sm:$0xff] %v222_v9 }
 0x181   : > { %208 = vst [vmem:[#allocation1] sm:$0xff] %v207_v10 }
 0x19c   :  { %v257_v14 = vpop.trf.xlu0 }
 0x19d   :  { %273 = vst [vmem:[#allocation5] sm:$0x1] %v257_v14 }
 0x1a4   :  { %v286_v15 = vld [vmem:[#allocation5] sm:$0x1] }
 0x1a5   :  { %289 = vst [vmem:[#allocation6] sm:$0x1] %v286_v15 }
 0x1a6 LB: > { %v337_v16 = vld [vmem:[%s718_s6] sm:$0xff]  ;;  %s339_s6 = scalar_lea.vmem %s718_s6, 8   ;;  %s718_s6 = sphi %s716_s6, %s339_s6   ;;  %s714_s5 = sphi %s712_s5, %s340_s5  }
 0x1a7   : > { %338 = vst [vmem:[%s714_s5] sm:$0xff] %v337_v16  ;;  %s340_s5 = scalar_lea.vmem %s714_s5, 8   ;;  %p334_p4 = scmp.gt.s32.totalorder %s339_s6, [#allocation1 + $0x8] }
 0x1a8   :  { %s721_s7 = smov (%p334_p4), [#allocation3]   ;;  %s722_s9 = smov (%p334_p4), [#allocation6]  }
 0x1a9   :  { %336 = sbr.rel (!%p334_p4) target bundleno = 422 (0x1a6), region = 178  ;;  %s358_s8 = sshll.u32 (%p334_p4), %s721_s7, 4  ;;  %s359_s8 = int_to_ptr.vmem [resolvable:$true] %s358_s8 }
 0x1aa   :  { %s367_s10 = sshll.u32 (%p334_p4), %s722_s9, 4  ;;  %s588_s1 = scalar_lea.vmem (%p334_p4), %s359_s8, 16  ;;  %s368_s10 = int_to_ptr.vmem [resolvable:$true] %s367_s10 }
 0x1ab   :  { %p589_p5 = scmp.ne.s32.totalorder (%p334_p4), %s359_s8, %s588_s1  ;;  %s592_s11 = scalar_lea.vmem (%p334_p4), %s359_s8, 32 }
 0x1ac   :  { %p593_p6 = scmp.lt.s32.totalorder (%p334_p4), %s359_s8, %s359_s8  ;;  %p594_p7 = scmp.lt.s32.totalorder (%p334_p4), %s592_s11, %s588_s1 }
 0x1ae   :  { %p595_p8 = por %p594_p7, %p593_p6 }
 0x1b0   :  { %p596_p9 = pnand %p595_p8, %p589_p5 }
 0x1b2   :  { %599 = shalt.err (!%p596_p9)
}
 0x1b3   :  { %361 = dma.vmem_to_hbm [thread:$0]  %s359_s8, 16, %s820_s2, [#allocation4]  }
 0x1b4   :  { %s608_s14 = scalar_lea.vmem %s368_s10, 16  ;;  %s612_s15 = scalar_lea.vmem %s368_s10, 32 }
 0x1b5   :  { %p609_p10 = scmp.ne.s32.totalorder %s368_s10, %s608_s14  ;;  %p613_p11 = scmp.lt.s32.totalorder %s368_s10, %s368_s10 }
 0x1b6   :  { %p614_p12 = scmp.lt.s32.totalorder %s612_s15, %s608_s14 }
 0x1b8   :  { %p615_p13 = por %p614_p12, %p613_p11 }
 0x1ba   :  { %p616_p0 = pnand %p615_p13, %p609_p10 }
 0x1bc   :  { %619 = shalt.err (!%p616_p0)
}
 0x1bd   :  { %370 = dma.vmem_to_hbm [thread:$0]  %s368_s10, 16, %s821_s3, [#allocation7]  }
 0x1be   :  { %692 = dma.done.wait [#allocation4], 16  }
 0x1bf   :  { %693 = vsyncadd [#allocation4], 4294967280 }
 0x1c0   :  { %694 = dma.done.wait [#allocation7], 16  }
 0x1c1   :  { %695 = vsyncadd [#allocation7], 4294967280 }
 0x1c2   :  { %377 = vsyncpa [#allocation4], 1 }
 0x1c3   :  { %378 = vsyncpa [#allocation7], 1 }

// kernel: forward.1
= control target key start
LH: loop header
LB: loop body
LE: loop exit
PB: predicated region body
PF: predicated region fallthrough
CT: control target
= control target key end

     0   :  { %s1870_s0 = inlined_call_operand.vmem [shape: s32[2], index: 0, kind: input, shape index: {}]   ;;  %s1871_s1 = inlined_call_operand.vmem [shape: f32[2,40,16], index: 1, kind: input, shape index: {}]   ;;  %s1872_s2 = inlined_call_operand.vmem [shape: f32[16,4], index: 2, kind: input, shape index: {}]   ;;  %s1873_s3 = inlined_call_operand.vmem [shape: f32[1,4], index: 3, kind: input, shape index: {}]   ;;  %s1874_s4 = inlined_call_operand.vmem [shape: f32[2,4,4], index: 4, kind: output, shape index: {0}]   ;;  %s1875_s5 = inlined_call_operand.vmem [shape: f32[2,1,4], index: 5, kind: output, shape index: {1}]   ;;  %s1876_s6 = inlined_call_operand.vmem [shape: f32[2,32,32], index: 6, kind: output, shape index: {2}]   ;;  %s1877_s7 = inlined_call_operand.vmem [shape: f32[2,1,32], index: 7, kind: output, shape index: {3}]  }
   0x1   :  { %s13_s26 = sshll.u32 %s1870_s0, 4  ;;  %s14_s26 = int_to_ptr.vmem [resolvable:$true] %s13_s26 }
   0x2   :  { %s1320_s27 = scalar_lea.vmem %s14_s26, 16  ;;  %p1325_p1 = scmp.lt.s32.totalorder %s14_s26, %s14_s26 }
   0x3   :  { %p1321_p0 = scmp.ne.s32.totalorder %s14_s26, %s1320_s27  ;;  %p1326_p2 = scmp.lt.s32.totalorder %s1320_s27, %s1320_s27 }
   0x5   :  { %p1327_p3 = por %p1326_p2, %p1325_p1 }
   0x7   :  { %p1328_p4 = pnand %p1327_p3, %p1321_p0 }
   0x9   :  { %1331 = shalt.err (!%p1328_p4)  }
   0xa   :  { %s1358_s28 = smov [#allocation3]  }
   0xb   :  { %16 = dma.vmem_to_smem %s14_s26, 16, %s1358_s28, [#allocation2] }
   0xc   :  { %1344 = dma.done.wait [#allocation2], 16 }
   0xd   :  { %1345 = vsyncadd [#allocation2], 4294967280 }
   0xe   :  { %18 = sfence }
   0xf   :  { %s1411_s29 = smov 0   ;;  %s1413_s30 = smov 0  }
  0x10   :  { %s1415_s8 = smov 0  }
  0x11 LB: > { %s36_s0 = sadd.s32 1, %s1352_s30  ;;  %p1183_p5 = scmp.ge.s32.totalorder %s1356_s8, 1  ;;  %s1356_s8 = sphi %s1415_s8, %s24_s8   ;;  %s1352_s30 = sphi %s1413_s30, %s1879_s30   ;;  %s1348_s29 = sphi %s1411_s29, %s1878_s29  }
  0x12   : > { %p38_p6 = scmp.ge.s32.totalorder %s36_s0, 2  ;;  %p250_p7 = scmp.lt.s32.totalorder %s1356_s8, 3 }
  0x14   : > { %s1881_s0 = smov (%p38_p6, %s36_s0), 0  ;;  %p251_p8 = pnand %p1183_p5, %p250_p7 }
  0x15   : > { %p294_p9 = scmp.lt.s32.totalorder (!%p251_p8), %s1348_s29, 1  ;;  %p335_p10 = scmp.lt.s32.totalorder (!%p251_p8), %s1348_s29, 2 }
  0x16   : > { %254 = sbr.rel (%p251_p8) target bundleno = 742 (0x2e6), region = 32  ;;  %s1361_s26 = smov (!%p251_p8), 12  }
  0x17   : > { %s1362_s27 = smov (!%p251_p8), 4   ;;  %s1363_s10 = smov (!%p251_p8), 16  }
  0x18   : > { %s1364_s11 = smov (!%p251_p8), 8   ;;  %s1365_s12 = smov (!%p251_p8), 24  }
  0x1b   : > { %v346_v0 = vld [vmem:[%s1872_s2 + $0x8] sm:$0xff]  ;;  %v1359_v1 = vmov 0.0   ;;  %v345_v2 = vld [vmem:[%s1872_s2] sm:$0xff]  ;;  %vm1360_vm0 = vmmov 0   ;;  %s1442_s13 = scalar_select %p294_p9, %s1348_s29, 1  ;;  %vm354_vm1 = vcmask 130048   ;;  %v460_v11 = vlaneseq }
  0x1c   : > { %1237 = vmatprep.subr.mxu0 %v1359_v1  ;;  %1241 = vmatprep.mubr.msk.f32.mxu0 %vm1360_vm0, %v1359_v1  ;;  %vm325_vm2 = vcmask 24576   ;;  %v1478_v8 = vld [vmem:[%s1873_s3] ss:$0 sm:$0xff]  ;;  %vm677_vm3 = vcmask 1044480   ;;  %vm623_vm4 = vcmask 1046528   ;;  %vm704_vm5 = vcmask 1043456  }
  0x1d   : > { %1238 = vmatpush3.msra.mxu0 %v346_v0  ;;  %1256 = vmatprep.subr.mxu1 %v1359_v1  ;;  %s297_s14 = scalar_select %p294_p9, %s1442_s13, 1  ;;  %v1489_v16 = vshrl.u32 %v460_v11, 7  ;;  %vm650_vm6 = vcmask 1045504   ;;  %vm758_vm7 = vcmask 1041408   ;;  %vm731_vm10 = vcmask 1042432  }
  0x1e   : > { %1239 = vmatprep.subr.mxu0 %v1359_v1  ;;  %1266 = vmatprep.mubr.msk.f32.mxu1 %vm1360_vm0, %v1359_v1  ;;  %s1469_s21 = scalar_lea.vmem %s1875_s5, %s1442_s13  ;;  %s338_s22 = sld [smem:[#allocation3 + %s1442_s13]]  ;;  %vm327_vm11 = vcmask 261120   ;;  %vm785_vm12 = vcmask 1040384  }
  0x1f   : > { %1240 = vmatpush3.msra.mxu0 %v345_v2  ;;  %s1285_s15 = smul.u32 40, %s297_s14  ;;  %326 = vst.msk [vmem:[%s1469_s21] sm:$0x1] %vm325_vm2, %v1359_v1  ;;  %v1499_v23 = vadd.s32 8, %v1489_v16  ;;  %s1214_s25 = sshll.u32 %s1442_s13, 5  ;;  %v1535_v38 = vadd.s32 16, %v1489_v16 }
  0x20   : > { %s1517_s9 = scalar_lea.vmem %s1876_s6, %s1214_s25  ;;  %v1538_v39 = vadd.s32 24, %v1489_v16  ;;  %v1543_v42 = vadd.s32 32, %v1489_v16  ;;  %s1366_s14 = smov 20  }
  0x21   : > { %s300_s18 = scalar_lea.vmem %s1871_s1, %s1285_s15  ;;  %328 = vst.msk [vmem:[%s1517_s9] sm:$0xff] %vm327_vm11, %v1359_v1  ;;  %329 = vst.msk [vmem:[%s1517_s9 + $0x8] sm:$0xff] %vm327_vm11, %v1359_v1  ;;  %s1367_s15 = smov 28  }
  0x22   : > { %v340_v3 = vld [vmem:[%s300_s18] sm:$0xff]  ;;  %v341_v4 = vld [vmem:[%s300_s18 + $0x8] sm:$0xff]  ;;  %v342_v5 = vld [vmem:[%s300_s18 + $0x10] sm:$0xff]  ;;  %330 = vst.msk [vmem:[%s1517_s9 + $0x10] sm:$0xff] %vm327_vm11, %v1359_v1  ;;  %s1188_s20 = sshll.u32 %s1442_s13, 2 }
  0x23   : > { %1242 = vmatmul.mubr.msk.f32.vlgmr.msra.gmra.mxu0 %vm354_vm1, %v340_v3  ;;  %v343_v6 = vld [vmem:[%s300_s18 + $0x18] sm:$0xff]  ;;  %v344_v7 = vld [vmem:[%s300_s18 + $0x20] sm:$0xff]  ;;  %331 = vst.msk [vmem:[%s1517_s9 + $0x18] sm:$0xff] %vm327_vm11, %v1359_v1  ;;  %s1723_s18 = scalar_lea.vmem %s1877_s7, %s1442_s13  ;;  %s1821_s23 = scalar_lea.vmem %s1874_s4, %s1188_s20 }
  0x24   : > { %1244 = vmatprep.mubr.msk.f32.mxu0 %vm1360_vm0, %v1359_v1  ;;  %s1883_s22 = smov (!%p335_p10, %s338_s22), 0 }
  0x25   : > { %v1496_v22 = vstv %s1883_s22  ;;  %s852_s19 = sadd.s32 4294967289, %s1883_s22 }
  0x26   : > { %vm467_vm8 = vcmp.lt.s32.totalorder %v1489_v16, %v1496_v22  ;;  %vm468_vm9 = vcmp.lt.s32.totalorder %v1499_v23, %v1496_v22  ;;  %vm469_vm13 = vcmp.lt.s32.totalorder %v1535_v38, %v1496_v22  ;;  %vm470_vm14 = vcmp.lt.s32.totalorder %v1538_v39, %v1496_v22 }
  0x27   : > { %1245 = vmatmul.mubr.msk.f32.gmra.mxu0 %vm354_vm1, %v341_v4  ;;  %v1197_v45 = vsel %vm467_vm8, 1.0, %v1359_v1  ;;  %v1198_v46 = vsel %vm468_vm9, 1.0, %v1359_v1  ;;  %vm471_vm15 = vcmp.lt.s32.totalorder %v1543_v42, %v1496_v22  ;;  %v1199_v60 = vsel %vm469_vm13, 1.0, %v1359_v1 }
  0x28   : > { %1247 = vmatprep.mubr.msk.f32.mxu0 %vm1360_vm0, %v1359_v1  ;;  %v1200_v61 = vsel %vm470_vm14, 1.0, %v1359_v1  ;;  %v1201_v62 = vsel %vm471_vm15, 1.0, %v1359_v1  ;;  %vm846_vm8 = vcmask 228352   ;;  %vm323_vm14 = vcmask 27648  }
  0x29   : > { %324 = vst.msk [vmem:[%s1821_s23] sm:$0xf] %vm323_vm14, %v1359_v1 }
  0x2b   : > { %1248 = vmatmul.mubr.msk.f32.gmra.mxu0 %vm354_vm1, %v342_v5 }
  0x2c   : > { %1250 = vmatprep.mubr.msk.f32.mxu0 %vm1360_vm0, %v1359_v1 }
  0x2f   : > { %1251 = vmatmul.mubr.msk.f32.gmra.mxu0 %vm354_vm1, %v343_v6 }
  0x30   : > { %1253 = vmatprep.mubr.msk.f32.mxu0 %vm1360_vm0, %v1359_v1  ;;  %vm598_vm0 = vcmask 31744  }
  0x33   : > { %1254 = vmatmul.mubr.msk.f32.gmra.mxu0 %vm354_vm1, %v344_v7 }
  0xe3   : > { %v436_v9 = vpop.f32.mrf.mxu0 }
  0xe4   : > { %v1482_v12 = vadd.f32 %v1478_v8, %v436_v9 }
  0xe5   : > { %v1243_v10 = vpop.f32.mrf.mxu0 }
  0xe6   : > { %v678_v17 = vrot.slane %v1482_v12, 3  ;;  %v624_v19 = vrot.slane %v1482_v12, 1  ;;  %v705_v29 = vrot.slane %v1482_v12, 4  ;;  %v651_v30 = vrot.slane %v1482_v12, 2 }
  0xe7   : > { %v441_v13 = vpop.f32.mrf.mxu0  ;;  %v759_v40 = vrot.slane %v1482_v12, 6  ;;  %v732_v41 = vrot.slane %v1482_v12, 5  ;;  %v786_v53 = vrot.slane %v1482_v12, 7  ;;  %v1594_v55 = vmul.f32 %v1197_v45, %v1482_v12  ;;  %v597_v45 = vld [vmem:[%s1469_s21] sm:$0x1] }
  0xe8   : > { %v1487_v14 = vadd.f32 %v1478_v8, %v441_v13 }
  0xe9   : > { %v1246_v15 = vpop.f32.mrf.mxu0  ;;  %v599_v2 = vsel %vm598_vm0, %v1594_v55, 0.0 }
  0xea   : > { %v679_v18 = vrot.slane %v1487_v14, 3  ;;  %v625_v20 = vrot.slane %v1487_v14, 1  ;;  %v706_v26 = vrot.slane %v1487_v14, 4  ;;  %v652_v27 = vrot.slane %v1487_v14, 2 }
  0xeb   : > { %v446_v21 = vpop.f32.mrf.mxu0  ;;  %v760_v32 = vrot.slane %v1487_v14, 6  ;;  %v733_v36 = vrot.slane %v1487_v14, 5  ;;  %v787_v44 = vrot.slane %v1487_v14, 7  ;;  %v1588_v54 = vmul.f32 %v1198_v46, %v1487_v14 }
  0xec   : > { %v680_v24 = vsel %vm677_vm3, %v678_v17, %v679_v18  ;;  %v626_v25 = vsel %vm623_vm4, %v624_v19, %v625_v20  ;;  %v1525_v33 = vadd.f32 %v1478_v8, %v446_v21  ;;  %v707_v34 = vsel %vm704_vm5, %v705_v29, %v706_v26 }
  0xed   : > { %689 = vrot.lane.b32.xlu1 %v680_v24, %s1361_s26  ;;  %635 = vrot.lane.b32.xlu0 %v626_v25, %s1362_s27  ;;  %v1249_v28 = vpop.f32.mrf.mxu0  ;;  %v653_v35 = vsel %vm650_vm6, %v651_v30, %v652_v27  ;;  %v761_v48 = vsel %vm758_vm7, %v759_v40, %v760_v32  ;;  %v734_v49 = vsel %vm731_vm10, %v732_v41, %v733_v36  ;;  %v600_v63 = vsel %vm598_vm0, %v1588_v54, 0.0 }
  0xee   : > { %v654_v50 = vrot.slane %v1525_v33, 2  ;;  %v788_v56 = vsel %vm785_vm12, %v786_v53, %v787_v44  ;;  %v708_v58 = vrot.slane %v1525_v33, 4  ;;  %v627_v59 = vrot.slane %v1525_v33, 1 }
  0xef   : > { %v451_v31 = vpop.f32.mrf.mxu0  ;;  %v735_v0 = vrot.slane %v1525_v33, 5  ;;  %v1626_v4 = vmul.f32 %v1199_v60, %v1525_v33  ;;  %v601_v9 = vadd.f32 %v600_v63, %v599_v2  ;;  %v762_v17 = vrot.slane %v1525_v33, 6 }
  0xf0   : > { %v1583_v52 = vadd.f32 %v1478_v8, %v451_v31  ;;  %v655_v57 = vsel %vm650_vm6, %v652_v27, %v654_v50  ;;  %v709_v3 = vsel %vm704_vm5, %v706_v26, %v708_v58  ;;  %v628_v7 = vsel %vm623_vm4, %v625_v20, %v627_v59 }
  0xf1   : > { %716 = vrot.lane.b32.xlu1 %v707_v34, %s1363_s10  ;;  %662 = vrot.lane.b32.xlu0 %v653_v35, %s1364_s11  ;;  %v1252_v37 = vpop.f32.mrf.mxu0  ;;  %v602_v10 = vsel %vm598_vm0, %v1626_v4, 0.0  ;;  %v736_v15 = vsel %vm731_vm10, %v733_v36, %v735_v0  ;;  %v763_v25 = vsel %vm758_vm7, %v760_v32, %v762_v17  ;;  %v789_v26 = vrot.slane %v1525_v33, 7 }
  0xf2   : > { %v1629_v5 = vmul.f32 %v1200_v61, %v1583_v52  ;;  %v603_v13 = vadd.f32 %v602_v10, %v601_v9  ;;  %v656_v21 = vrot.slane %v1583_v52, 2  ;;  %v683_v28 = vrot.slane %v1583_v52, 3 }
  0xf3   : > { %v456_v43 = vpop.f32.mrf.mxu0  ;;  %v790_v30 = vsel %vm785_vm12, %v787_v44, %v789_v26  ;;  %v629_v31 = vrot.slane %v1583_v52, 1  ;;  %v710_v34 = vrot.slane %v1583_v52, 4  ;;  %v791_v40 = vrot.slane %v1583_v52, 7 }
  0xf4   : > { %v1567_v47 = vadd.f32 %v1478_v8, %v456_v43  ;;  %v681_v8 = vrot.slane %v1525_v33, 3  ;;  %v604_v11 = vsel %vm598_vm0, %v1629_v5, 0.0  ;;  %v657_v27 = vsel %vm650_vm6, %v654_v50, %v656_v21 }
  0xf5   : > { %770 = vrot.lane.b32.xlu1 %v761_v48, %s1365_s12  ;;  %743 = vrot.lane.b32.xlu0 %v734_v49, %s1366_s14  ;;  %v1255_v51 = vpop.f32.mrf.mxu0  ;;  %v605_v22 = vadd.f32 %v604_v11, %v603_v13  ;;  %v630_v37 = vsel %vm623_vm4, %v627_v59, %v629_v31  ;;  %v711_v41 = vsel %vm704_vm5, %v708_v58, %v710_v34  ;;  %v737_v43 = vrot.slane %v1583_v52, 5 }
  0xf6   : > { %1257 = vmatpush3.msra.mxu1 %v1567_v47  ;;  %v1632_v6 = vmul.f32 %v1201_v62, %v1567_v47  ;;  %v682_v20 = vsel %vm677_vm3, %v679_v18, %v681_v8  ;;  %v684_v32 = vsel %vm677_vm3, %v681_v8, %v683_v28  ;;  %v792_v48 = vsel %vm785_vm12, %v789_v26, %v791_v40 }
  0xf7   : > { %1258 = vmatprep.subr.mxu1 %v1359_v1  ;;  %v631_v49 = vrot.slane %v1567_v47, 1  ;;  %v738_v50 = vsel %vm731_vm10, %v735_v0, %v737_v43  ;;  %v764_v51 = vrot.slane %v1583_v52, 6  ;;  %v633_v59 = vrot.slane %v1359_v1, 1 }
  0xf8   : > { %1259 = vmatpush3.msra.mxu1 %v1583_v52  ;;  %v606_v19 = vsel %vm598_vm0, %v1632_v6, 0.0  ;;  %v685_v61 = vrot.slane %v1567_v47, 3  ;;  %v660_v63 = vrot.slane %v1359_v1, 2  ;;  %v712_v2 = vrot.slane %v1567_v47, 4 }
  0xf9   : > { %797 = vrot.lane.b32.xlu1 %v788_v56, %s1367_s15  ;;  %664 = vrot.lane.b32.xlu0 %v655_v57, %s1364_s11  ;;  %v607_v24 = vadd.f32 %v606_v19, %v605_v22  ;;  %v632_v56 = vsel %vm623_vm4, %v629_v31, %v631_v49  ;;  %v658_v57 = vrot.slane %v1567_v47, 2  ;;  %v765_v58 = vsel %vm758_vm7, %v762_v17, %v764_v51 }
  0xfa   : > { %1260 = vmatprep.subr.mxu1 %v1359_v1  ;;  %v634_v62 = vsel %vm623_vm4, %v631_v49, %v633_v59  ;;  %v686_v0 = vsel %vm677_vm3, %v683_v28, %v685_v61  ;;  %v713_v8 = vsel %vm704_vm5, %v710_v34, %v712_v2  ;;  %v687_v9 = vrot.slane %v1359_v1, 3 }
  0xfb   : > { %1261 = vmatpush3.msra.mxu1 %v1525_v33  ;;  %v608_v29 = vrot.slane %v607_v24, 4  ;;  %v659_v60 = vsel %vm650_vm6, %v656_v21, %v658_v57  ;;  %v714_v11 = vrot.slane %v1359_v1, 4  ;;  %v741_v19 = vrot.slane %v1359_v1, 5 }
  0xfc   : > { %1262 = vmatprep.subr.mxu1 %v1359_v1  ;;  %v688_v13 = vsel %vm677_vm3, %v685_v61, %v687_v9  ;;  %v793_v21 = vrot.slane %v1567_v47, 7  ;;  %v795_v26 = vrot.slane %v1359_v1, 7  ;;  %vm817_vm3 = vcmask 64512  }
  0xfd   : > { %1263 = vmatpush3.msra.mxu1 %v1487_v14  ;;  %718 = vrot.lane.b32.xlu0 %v709_v3, %s1363_s10  ;;  %v609_v18 = vadd.f32 %v608_v29, %v607_v24  ;;  %v661_v3 = vsel %vm650_vm6, %v658_v57, %v660_v63  ;;  %v715_v17 = vsel %vm704_vm5, %v712_v2, %v714_v11  ;;  %v768_v24 = vrot.slane %v1359_v1, 6 }
  0xfe   : > { %637 = vrot.lane.b32.xlu1 %v628_v7, %s1362_s27  ;;  %1264 = vmatprep.subr.mxu1 %v1359_v1  ;;  %v739_v7 = vrot.slane %v1567_v47, 5  ;;  %v796_v28 = vsel %vm785_vm12, %v793_v21, %v795_v26  ;;  %vm823_vm4 = vcmask 97280   ;;  %vm834_vm5 = vcmask 162816  }
  0xff   : > { %1265 = vmatpush3.msra.mxu1 %v1482_v12  ;;  %v610_v35 = vrot.slane %v609_v18, 2 }
 0x100   : > { %v740_v10 = vsel %vm731_vm10, %v737_v43, %v739_v7  ;;  %v742_v22 = vsel %vm731_vm10, %v739_v7, %v741_v19 }
 0x101   : > { %745 = vrot.lane.b32.xlu0 %v736_v15, %s1366_s14  ;;  %v611_v36 = vadd.f32 %v610_v35, %v609_v18  ;;  %v766_v15 = vrot.slane %v1567_v47, 6  ;;  %v1750_v35 = vstv %s852_s19 }
 0x102   : > { %691 = vrot.lane.b32.xlu1 %v682_v20, %s1361_s26  ;;  %vm854_vm6 = vcmp.lt.s32.totalorder %v1489_v16, %v1750_v35  ;;  %vm855_vm9 = vcmp.lt.s32.totalorder %v1499_v23, %v1750_v35  ;;  %vm856_vm10 = vcmp.lt.s32.totalorder %v1535_v38, %v1750_v35  ;;  %vm858_vm13 = vcmp.lt.s32.totalorder %v1543_v42, %v1750_v35 }
 0x103   : > { %v612_v44 = vrot.slane %v611_v36, 1  ;;  %v767_v20 = vsel %vm758_vm7, %v764_v51, %v766_v15 }
 0x105   : > { %772 = vrot.lane.b32.xlu0 %v763_v25, %s1365_s12  ;;  %v613_v46 = vadd.f32 %v612_v44, %v611_v36  ;;  %v794_v25 = vsel %vm785_vm12, %v791_v40, %v793_v21  ;;  %vm857_vm12 = vcmp.lt.s32.totalorder %v1538_v39, %v1750_v35 }
 0x106   : > { %666 = vrot.lane.b32.xlu1 %v657_v27, %s1364_s11  ;;  %v769_v27 = vsel %vm758_vm7, %v766_v15, %v768_v24  ;;  %vm840_vm7 = vcmask 195584   ;;  %v1205_v15 = vsel %vm856_vm10, 1.0, %v1359_v1 }
 0x107   : > { %v614_v53 = vadd.f32 %v613_v46, %v597_v45 }
 0x109   : > { %799 = vrot.lane.b32.xlu0 %v790_v30, %s1367_s15  ;;  %616 = vst.msk [vmem:[%s1469_s21] sm:$0x1] %vm325_vm2, %v614_v53  ;;  %vm332_vm2 = vcmask 253952  }
 0x10a   : > { %693 = vrot.lane.b32.xlu1 %v684_v32, %s1361_s26  ;;  %333 = vst.msk [vmem:[%s1723_s18] sm:$0x1] %vm332_vm2, %v1359_v1 }
 0x10d   : > { %639 = vrot.lane.b32.xlu0 %v630_v37, %s1362_s27 }
 0x10e   : > { %720 = vrot.lane.b32.xlu1 %v711_v41, %s1363_s10 }
 0x111   : > { %801 = vrot.lane.b32.xlu0 %v792_v48, %s1367_s15 }
 0x112   : > { %747 = vrot.lane.b32.xlu1 %v738_v50, %s1366_s14 }
 0x115   : > { %641 = vrot.lane.b32.xlu0 %v632_v56, %s1362_s27 }
 0x116   : > { %774 = vrot.lane.b32.xlu1 %v765_v58, %s1365_s12  ;;  %v1204_v58 = vsel %vm855_vm9, 1.0, %v1359_v1 }
 0x119   : > { %668 = vrot.lane.b32.xlu0 %v659_v60, %s1364_s11 }
 0x11a   : > { %643 = vrot.lane.b32.xlu1 %v634_v62, %s1362_s27 }
 0x11d   : > { %695 = vrot.lane.b32.xlu0 %v686_v0, %s1361_s26 }
 0x11e   : > { %670 = vrot.lane.b32.xlu1 %v661_v3, %s1364_s11 }
 0x121   : > { %722 = vrot.lane.b32.xlu0 %v713_v8, %s1363_s10 }
 0x122   : > { %749 = vrot.lane.b32.xlu1 %v740_v10, %s1366_s14 }
 0x125   : > { %697 = vrot.lane.b32.xlu0 %v688_v13, %s1361_s26 }
 0x126   : > { %724 = vrot.lane.b32.xlu1 %v715_v17, %s1363_s10 }
 0x129   : > { %776 = vrot.lane.b32.xlu0 %v767_v20, %s1365_s12 }
 0x12a   : > { %751 = vrot.lane.b32.xlu1 %v742_v22, %s1366_s14 }
 0x12d   : > { %803 = vrot.lane.b32.xlu0 %v794_v25, %s1367_s15 }
 0x12e   : > { %778 = vrot.lane.b32.xlu1 %v769_v27, %s1365_s12 }
 0x131   : > { %805 = vrot.lane.b32.xlu0 %v796_v28, %s1367_s15 }
 0x157   : > { %488 = vxpose.xlu1.b32.start [1/5] (short) (narrow) %v1594_v55, 8 }
 0x15b   : > { %489 = vxpose.xlu1.b32.cont [2/5] (short) (narrow) %v1588_v54, 8 }
 0x15f   : > { %490 = vxpose.xlu1.b32.cont [3/5] (short) (narrow) %v1626_v4, 8  ;;  %v690_v29 = vpop.permute.xlu1 %689  ;;  %v636_v18 = vpop.permute.xlu0 %635 }
 0x160   : > { %v812_v30 = vsel %vm598_vm0, %v1482_v12, %v636_v18 }
 0x163   : > { %491 = vxpose.xlu1.b32.cont [4/5] (short) (narrow) %v1629_v5, 8  ;;  %v717_v31 = vpop.permute.xlu1 %716  ;;  %v663_v32 = vpop.permute.xlu0 %662  ;;  %v1203_v5 = vsel %vm854_vm6, 1.0, %v1359_v1 }
 0x164   : > { %v818_v34 = vsel %vm817_vm3, %v812_v30, %v663_v32 }
 0x165   : > { %v824_v54 = vsel %vm823_vm4, %v818_v34, %v690_v29 }
 0x166   : > { %v829_v55 = vsel %vm354_vm1, %v824_v54, %v717_v31 }
 0x167   : > { %492 = vxpose.xlu1.b32.end [5/5] (short) (narrow) %v1632_v6, 8  ;;  %v771_v4 = vpop.permute.xlu1 %770  ;;  %v744_v36 = vpop.permute.xlu0 %743 }
 0x168   : > { %v835_v12 = vsel %vm834_vm5, %v829_v55, %v744_v36 }
 0x169   : > { %v841_v40 = vsel %vm840_vm7, %v835_v12, %v771_v4  ;;  %v1206_v4 = vsel %vm857_vm12, 1.0, %v1359_v1 }
 0x16b   : > { %v798_v37 = vpop.permute.xlu1 %797  ;;  %v665_v41 = vpop.permute.xlu0 %664 }
 0x16c   : > { %v1761_v43 = vsel %vm846_vm8, %v841_v40, %v798_v37 }
 0x16d   : > { %v1764_v6 = vmul.f32 %v1203_v5, %v1761_v43 }
 0x16f   : > { %v719_v44 = vpop.permute.xlu0 %718  ;;  %878 = vxpose.xlu0.b32.start [1/5] (short) (narrow) %v1764_v6, 32  ;;  %v1017_v37 = vsel %vm327_vm11, %v1764_v6, 0.0 }
 0x170   : > { %v638_v16 = vpop.permute.xlu1 %637 }
 0x171   : > { %v813_v45 = vsel %vm598_vm0, %v1487_v14, %v638_v16  ;;  %v1207_v16 = vsel %vm858_vm13, 1.0, %v1359_v1 }
 0x172   : > { %v819_v48 = vsel %vm817_vm3, %v813_v45, %v665_v41 }
 0x173   : > { %v746_v46 = vpop.permute.xlu0 %745 }
 0x174   : > { %v692_v49 = vpop.permute.xlu1 %691 }
 0x175   : > { %v825_v50 = vsel %vm823_vm4, %v819_v48, %v692_v49 }
 0x176   : > { %v830_v51 = vsel %vm354_vm1, %v825_v50, %v719_v44 }
 0x177   : > { %v773_v53 = vpop.permute.xlu0 %772  ;;  %v836_v56 = vsel %vm834_vm5, %v830_v51, %v746_v46 }
 0x178   : > { %v667_v57 = vpop.permute.xlu1 %666  ;;  %v842_v59 = vsel %vm840_vm7, %v836_v56, %v773_v53 }
 0x17b   : > { %v800_v14 = vpop.permute.xlu0 %799 }
 0x17c   : > { %v1778_v60 = vsel %vm846_vm8, %v842_v59, %v800_v14  ;;  %v694_v61 = vpop.permute.xlu1 %693 }
 0x17d   : > { %v870_v62 = vmul.f32 %v1204_v58, %v1778_v60 }
 0x17f   : > { %v640_v63 = vpop.permute.xlu0 %639  ;;  %879 = vxpose.xlu0.b32.cont [2/5] (short) (narrow) %v870_v62, 32  ;;  %v1018_v36 = vsel %vm327_vm11, %v870_v62, 0.0 }
 0x180   : > { %v721_v0 = vpop.permute.xlu1 %720  ;;  %v814_v23 = vsel %vm598_vm0, %v1525_v33, %v640_v63  ;;  %v1019_v42 = vadd.f32 %v1018_v36, %v1017_v37 }
 0x181   : > { %v820_v2 = vsel %vm817_vm3, %v814_v23, %v667_v57 }
 0x182   : > { %v826_v3 = vsel %vm823_vm4, %v820_v2, %v694_v61  ;;  %v1016_v61 = vld [vmem:[%s1723_s18] sm:$0x1] }
 0x183   : > { %v802_v7 = vpop.permute.xlu0 %801  ;;  %v831_v9 = vsel %vm354_vm1, %v826_v3, %v721_v0 }
 0x184   : > { %v748_v8 = vpop.permute.xlu1 %747 }
 0x185   : > { %v837_v11 = vsel %vm834_vm5, %v831_v9, %v748_v8 }
 0x187   : > { %v642_v10 = vpop.permute.xlu0 %641 }
 0x188   : > { %v775_v13 = vpop.permute.xlu1 %774  ;;  %v815_v27 = vsel %vm598_vm0, %v1583_v52, %v642_v10  ;;  %v875_v10 = vld [vmem:[%s1517_s9 + $0x8] sm:$0xff] }
 0x189   : > { %v843_v17 = vsel %vm840_vm7, %v837_v11, %v775_v13  ;;  %v874_v13 = vld [vmem:[%s1517_s9] sm:$0xff] }
 0x18a   : > { %v1792_v33 = vsel %vm846_vm8, %v843_v17, %v802_v7 }
 0x18b   : > { %v669_v19 = vpop.permute.xlu0 %668  ;;  %v871_v20 = vmul.f32 %v1205_v15, %v1792_v33 }
 0x18c   : > { %v644_v21 = vpop.permute.xlu1 %643  ;;  %v821_v29 = vsel %vm817_vm3, %v815_v27, %v669_v19  ;;  %v877_v19 = vld [vmem:[%s1517_s9 + $0x18] sm:$0xff] }
 0x18d   : > { %880 = vxpose.xlu0.b32.cont [3/5] (short) (narrow) %v871_v20, 32  ;;  %v816_v32 = vsel %vm598_vm0, %v1567_v47, %v644_v21  ;;  %v1020_v40 = vsel %vm327_vm11, %v871_v20, 0.0  ;;  %v876_v21 = vld [vmem:[%s1517_s9 + $0x10] sm:$0xff] }
 0x18e   : > { %v1021_v48 = vadd.f32 %v1020_v40, %v1019_v42 }
 0x18f   : > { %v696_v22 = vpop.permute.xlu0 %695 }
 0x190   : > { %v671_v24 = vpop.permute.xlu1 %670  ;;  %v827_v18 = vsel %vm823_vm4, %v821_v29, %v696_v22 }
 0x191   : > { %v822_v54 = vsel %vm817_vm3, %v816_v32, %v671_v24 }
 0x193   : > { %v723_v25 = vpop.permute.xlu0 %722 }
 0x194   : > { %v750_v38 = vpop.permute.xlu1 %749  ;;  %v832_v30 = vsel %vm354_vm1, %v827_v18, %v723_v25 }
 0x195   : > { %v838_v55 = vsel %vm834_vm5, %v832_v30, %v750_v38 }
 0x197   : > { %v698_v26 = vpop.permute.xlu0 %697 }
 0x198   : > { %v725_v28 = vpop.permute.xlu1 %724  ;;  %v828_v52 = vsel %vm823_vm4, %v822_v54, %v698_v26 }
 0x199   : > { %v833_v41 = vsel %vm354_vm1, %v828_v52, %v725_v28  ;;  %vm520_vm1 = vcmask 326656  }
 0x19b   : > { %v777_v31 = vpop.permute.xlu0 %776 }
 0x19c   : > { %v752_v34 = vpop.permute.xlu1 %751  ;;  %v844_v12 = vsel %vm840_vm7, %v838_v55, %v777_v31 }
 0x19d   : > { %v839_v35 = vsel %vm834_vm5, %v833_v41, %v752_v34 }
 0x19f   : > { %v804_v5 = vpop.permute.xlu0 %803 }
 0x1a0   : > { %v779_v39 = vpop.permute.xlu1 %778  ;;  %v850_v47 = vsel %vm846_vm8, %v844_v12, %v804_v5 }
 0x1a1   : > { %v872_v44 = vmul.f32 %v1206_v4, %v850_v47  ;;  %v845_v6 = vsel %vm840_vm7, %v839_v35, %v779_v39 }
 0x1a3   : > { %881 = vxpose.xlu0.b32.cont [4/5] (short) (narrow) %v872_v44, 32  ;;  %v1022_v45 = vsel %vm327_vm11, %v872_v44, 0.0  ;;  %v806_v46 = vpop.permute.xlu0 %805 }
 0x1a4   : > { %v851_v49 = vsel %vm846_vm8, %v845_v6, %v806_v46  ;;  %v1023_v51 = vadd.f32 %v1022_v45, %v1021_v48 }
 0x1a5   : > { %1269 = vmatprep.subr.mxu1 %v851_v49  ;;  %v873_v50 = vmul.f32 %v1207_v16, %v851_v49 }
 0x1a7   : > { %882 = vxpose.xlu0.b32.end [5/5] (short) (narrow) %v873_v50, 32  ;;  %v1024_v53 = vsel %vm327_vm11, %v873_v50, 0.0 }
 0x1a8   : > { %v1025_v56 = vadd.f32 %v1024_v53, %v1023_v51 }
 0x1aa   : > { %v1026_v57 = vrot.slane %v1025_v56, 4 }
 0x1ac   : > { %v1027_v1 = vadd.f32 %v1026_v57, %v1025_v56 }
 0x1ae   : > { %v1028_v58 = vrot.slane %v1027_v1, 2 }
 0x1b0   : > { %v1029_v59 = vadd.f32 %v1028_v58, %v1027_v1 }
 0x1b2   : > { %v1030_v14 = vrot.slane %v1029_v59, 1 }
 0x1b4   : > { %v1031_v62 = vadd.f32 %v1030_v14, %v1029_v59 }
 0x1b6   : > { %v1032_v63 = vadd.f32 %v1031_v62, %v1016_v61 }
 0x1b8   : > { %1034 = vst.msk [vmem:[%s1723_s18] sm:$0x1] %vm332_vm2, %v1032_v63 }
 0x1d3   : > { %v504_v0 = vpop.trf.xlu1 }
 0x1d4   : > { %1267 = vmatmul.mubr.msk.f32.vlgmr.msra.gmra.mxu1 %vm520_vm1, %v504_v0 }
 0x1d5   : > { %1270 = vmatpush3.msra.mxu1 %v851_v49 }
 0x1d6   : > { %1271 = vmatprep.subr.mxu1 %v850_v47 }
 0x1d7   : > { %1272 = vmatpush3.msra.mxu1 %v850_v47 }
 0x1d8   : > { %1273 = vmatprep.subr.mxu1 %v1792_v33 }
 0x1d9   : > { %1274 = vmatpush3.msra.mxu1 %v1792_v33 }
 0x1da   : > { %1275 = vmatprep.subr.mxu1 %v1778_v60 }
 0x1db   : > { %1276 = vmatpush3.msra.mxu1 %v1778_v60  ;;  %v487_v60 = vld [vmem:[%s1821_s23] sm:$0xf] }
 0x1dc   : > { %1277 = vmatprep.subr.mxu1 %v1761_v43 }
 0x1dd   : > { %1278 = vmatpush3.msra.mxu1 %v1761_v43 }
 0x213   : > { %v894_v23 = vpop.trf.xlu0 }
 0x214   : > { %1279 = vmatprep.mubr.msk.f32.mxu1 %vm520_vm1, %v894_v23 }
 0x217   : > { %v895_v2 = vpop.trf.xlu0 }
 0x218   : > { %1280 = vmatmul.mubr.msk.f32.vlgmr.msra.gmra.mxu1 %vm520_vm1, %v895_v2 }
 0x21b   : > { %v896_v3 = vpop.trf.xlu0 }
 0x21c   : > { %1282 = vmatprep.mubr.msk.f32.mxu1 %vm520_vm1, %v896_v3 }
 0x21f   : > { %v897_v7 = vpop.trf.xlu0 }
 0x220   : > { %1283 = vmatmul.mubr.msk.f32.gmra.mxu1 %vm520_vm1, %v897_v7 }
 0x294   : > { %v590_v8 = vpop.f32.mrf.mxu1 }
 0x295   : > { %v594_v43 = vadd.f32 %v590_v8, %v487_v60 }
 0x296   : > { %v1268_v9 = vpop.f32.mrf.mxu1 }
 0x297   : > { %596 = vst.msk [vmem:[%s1821_s23] sm:$0xf] %vm323_vm14, %v594_v43 }
 0x2d8   : > { %v1281_v11 = vpop.f32.mrf.mxu1 }
 0x2d9   : > { %v1008_v15 = vadd.f32 %v1281_v11, %v875_v10 }
 0x2da   : > { %v988_v17 = vpop.f32.mrf.mxu1 }
 0x2db   : > { %1013 = vst.msk [vmem:[%s1517_s9 + $0x8] sm:$0xff] %vm327_vm11, %v1008_v15  ;;  %v1007_v33 = vadd.f32 %v988_v17, %v874_v13 }
 0x2dd   : > { %1012 = vst.msk [vmem:[%s1517_s9] sm:$0xff] %vm327_vm11, %v1007_v33 }
 0x2e0   : > { %v1284_v20 = vpop.f32.mrf.mxu1 }
 0x2e1   : > { %v1010_v22 = vadd.f32 %v1284_v20, %v877_v19 }
 0x2e2   : > { %v998_v24 = vpop.f32.mrf.mxu1 }
 0x2e3   : > { %1015 = vst.msk [vmem:[%s1517_s9 + $0x18] sm:$0xff] %vm327_vm11, %v1010_v22  ;;  %v1009_v25 = vadd.f32 %v998_v24, %v876_v21 }
 0x2e5   : > { %1014 = vst.msk [vmem:[%s1517_s9 + $0x10] sm:$0xff] %vm327_vm11, %v1009_v25 }
 0x2e6 PF: > { %s24_s8 = sadd.s32 1, %s1356_s8   ;;  %s1878_s29 = smov %s1352_s30 }
 0x2e7   : > { %p21_p11 = scmp.ge.s32.totalorder %s24_s8, 4   ;;  %s1879_s30 = smov %s1881_s0 }
 0x2e9   :  { %23 = sbr.rel (!%p21_p11) target bundleno = 17 (0x11), region = 102 }

</bundles_post_ra>
